<compile_context>
chip_gen: v7x
topology: tpu7x:2x2x1
jax: 0.10.0
libtpu: 0.0.40
codegen_flags: <defaults>
</compile_context>

<pallas_src>
import jax
import jax.numpy as jnp
from jax.experimental import pallas as pl
from jax.experimental.pallas import tpu as pltpu

# Module hyper-parameters (small synthetic config consistent with the module).
CHANNEL = 8
REDUCTION = 2
KSIZE = 3
SCALE = 3
STRIDE = 1
SOFTMAX_SCALE = 10.0
ESCAPE_NAN = 1e-4
# 1/6 divisor applied after conv_transpose2d in the reference CSNLA forward
# (magic constant from the original repo, independent of ksize/scale).
INV_ASSEMBLY_DIV = 6.0


def _round_up(x, m):
    return ((x + m - 1) // m) * m


# --------------------------- Pallas kernels ---------------------------------

def _conv1x1_prelu_kernel(x_ref, w_ref, b_ref, a_ref, o_ref):
    # x: (TM, Cin), w: (Cin, Cout), b/a: (1, Cout)
    y = jnp.dot(x_ref[...], w_ref[...], preferred_element_type=jnp.float32)
    y = y + b_ref[...]
    o_ref[...] = jnp.where(y >= 0.0, y, a_ref[...] * y)


def conv1x1_prelu(x2d, w, b, alpha_vec, tile_m=512):
    """Row-tiled 1x1 conv (channel matmul) + bias + PReLU (per-column alpha).

    The row axis is tiled (grid axis marked "parallel") so the kernel
    double-buffers / pipelines and the VMEM footprint stays bounded at real
    H*W; the weight/bias/alpha blocks stay VMEM-resident across row tiles.
    """
    M, Cin = x2d.shape
    Cout = w.shape[1]
    TM = min(tile_m, _round_up(M, 8))
    Mp = _round_up(M, TM)
    xp = x2d.astype(jnp.float32)
    if Mp != M:
        xp = jnp.pad(xp, ((0, Mp - M), (0, 0)))
    b2 = b.reshape(1, Cout).astype(jnp.float32)
    a2 = alpha_vec.reshape(1, Cout).astype(jnp.float32)
    out = pl.pallas_call(
        _conv1x1_prelu_kernel,
        out_shape=jax.ShapeDtypeStruct((Mp, Cout), jnp.float32),
        grid=(Mp // TM,),
        in_specs=[pl.BlockSpec((TM, Cin), lambda i: (i, 0)),
                  pl.BlockSpec((Cin, Cout), lambda i: (0, 0)),
                  pl.BlockSpec((1, Cout), lambda i: (0, 0)),
                  pl.BlockSpec((1, Cout), lambda i: (0, 0))],
        out_specs=pl.BlockSpec((TM, Cout), lambda i: (i, 0)),
        compiler_params=pltpu.CompilerParams(
            dimension_semantics=("parallel",)),
    )(xp, w.astype(jnp.float32), b2, a2)
    return out[:M]


def _cross_scale_attn_kernel(xc_ref, wmt_ref, wa_ref, z_ref, p_ref):
    co = pl.program_id(2)

    # Compute the softmax attention weights once per (batch, query-tile) and
    # keep them in a bf16 VMEM scratch across the CO axis (innermost grid dim).
    @pl.when(co == 0)
    def _():
        xc = xc_ref[0]     # (TQ, Cr*k*k)  bf16  im2col of match_input (query tile)
        wmt = wmt_ref[0]   # (Cr*k*k, L)   bf16  pre-normalized * softmax_scale, transposed
        # conv2d(match_input, wi_normed) == im2col @ wi_normed^T (pre-transposed),
        # softmax_scale already folded into wmt.  MXU bf16 with f32 accumulation.
        s = jnp.dot(xc, wmt, preferred_element_type=jnp.float32)        # (TQ, L)
        # softmax over the L candidate patches; the 1/6 post-divisor of the
        # transposed conv is folded into the normalization reciprocal (EUP slot).
        s = s - jnp.max(s, axis=-1, keepdims=True)
        e = jnp.exp(s)
        inv = pl.reciprocal(
            INV_ASSEMBLY_DIV * jnp.sum(e, axis=-1, keepdims=True), approx=True)
        p_ref[...] = (e * inv).astype(jnp.bfloat16)

    # conv_transpose2d contraction: attention weights @ raw 9x9 patch slab.
    z_ref[0] = jnp.dot(p_ref[...], wa_ref[0],
                       preferred_element_type=jnp.float32)              # (TQ, TCO)


def cross_scale_attn_core(x_cols, w_match_t, w_asm, tile_q=512, tile_co=1024):
    """x_cols: (N, HW, CK) bf16; w_match_t: (N, CK, L) bf16; w_asm: (N, L, CO) bf16.
    Returns z: (N, HW, CO) f32 (already includes the 1/6 divisor)."""
    N, HW, CK = x_cols.shape
    L, CO = w_asm.shape[1], w_asm.shape[2]

    # Query-row tile: multiple of 16 (bf16 sublane packing); banks resident.
    TQ = min(tile_q, _round_up(HW, 16))
    HWp = _round_up(HW, TQ)
    if HWp != HW:
        x_cols = jnp.pad(x_cols, ((0, 0), (0, HWp - HW), (0, 0)))

    # Lane-dense CO tiling: zero-pad C*K*K up to a multiple of the CO tile so
    # every z store is an unmasked vst and w_asm streams in bounded slabs.
    TCO = min(tile_co, _round_up(CO, 128))
    CO_pad = _round_up(CO, TCO)
    if CO_pad != CO:
        w_asm = jnp.pad(w_asm, ((0, 0), (0, 0), (0, CO_pad - CO)))

    out = pl.pallas_call(
        _cross_scale_attn_kernel,
        out_shape=jax.ShapeDtypeStruct((N, HWp, CO_pad), jnp.float32),
        grid=(N, HWp // TQ, CO_pad // TCO),
        in_specs=[
            # query im2col tile: depends on (b, q) -> resident across co
            pl.BlockSpec((1, TQ, CK), lambda b, q, co: (b, q, 0)),
            # match bank: depends only on b -> VMEM-resident across (q, co)
            pl.BlockSpec((1, CK, L), lambda b, q, co: (b, 0, 0)),
            # raw-patch bank: streamed per CO tile
            pl.BlockSpec((1, L, TCO), lambda b, q, co: (b, 0, co)),
        ],
        out_specs=pl.BlockSpec((1, TQ, TCO), lambda b, q, co: (b, q, co)),
        scratch_shapes=[pltpu.VMEM((TQ, L), jnp.bfloat16)],
        compiler_params=pltpu.CompilerParams(
            dimension_semantics=("parallel", "parallel", "arbitrary")),
    )(x_cols, w_match_t, w_asm)
    return out[:, :HW, :CO]


# ------------------------------ JAX glue -------------------------------------

def same_pad(x, k, stride):
    """Replicates the repo's same_padding() (zero pad, floor split). Batched OK."""
    H, W = x.shape[-2:]
    oh = -(-H // stride)
    ow = -(-W // stride)
    ph = max(0, (oh - 1) * stride + k - H)
    pw = max(0, (ow - 1) * stride + k - W)
    pt, pb = ph // 2, ph - ph // 2
    pleft, pr = pw // 2, pw - pw // 2
    pad = [(0, 0)] * (x.ndim - 2) + [(pt, pb), (pleft, pr)]
    return jnp.pad(x, pad)


def extract_patches(x, k, stride):
    """x: (C, Hp, Wp) already padded -> (L, C, k, k), L ordered row-major."""
    C, Hp, Wp = x.shape
    oh = (Hp - k) // stride + 1
    ow = (Wp - k) // stride + 1
    rows = (jnp.arange(oh) * stride)[:, None] + jnp.arange(k)[None, :]   # (oh,k)
    cols = (jnp.arange(ow) * stride)[:, None] + jnp.arange(k)[None, :]   # (ow,k)
    g = x[:, rows[:, :, None, None], cols[None, None, :, :]]             # (C,oh,k,ow,k)
    g = jnp.transpose(g, (1, 3, 0, 2, 4))                                # (oh,ow,C,k,k)
    return g.reshape(oh * ow, C, k, k)


def extract_patches_b(x, k, stride):
    """Batched im2col: (N, C, Hp, Wp) -> (N, L, C*k*k) (features in (C,kh,kw) order)."""
    C = x.shape[1]
    return jax.vmap(lambda xi: extract_patches(xi, k, stride).reshape(-1, C * k * k))(x)


def bilinear_downsample(x, scale):
    """F.interpolate(scale_factor=1/scale, mode='bilinear', align_corners=False)."""
    N, C, H, W = x.shape
    Ho, Wo = H // scale, W // scale

    def idx_w(out_size, in_size):
        ratio = in_size / out_size
        src = (jnp.arange(out_size, dtype=jnp.float32) + 0.5) * ratio - 0.5
        src = jnp.maximum(src, 0.0)
        i0 = jnp.minimum(jnp.floor(src).astype(jnp.int32), in_size - 1)
        i1 = jnp.minimum(i0 + 1, in_size - 1)
        w1 = src - i0.astype(jnp.float32)
        return i0, i1, 1.0 - w1, w1

    h0, h1, wh0, wh1 = idx_w(Ho, H)
    w0, w1, ww0, ww1 = idx_w(Wo, W)
    xh = (x[:, :, h0, :] * wh0[None, None, :, None]
          + x[:, :, h1, :] * wh1[None, None, :, None])
    return xh[:, :, :, w0] * ww0 + xh[:, :, :, w1] * ww1


def fold_transposed(z, C, H, W, scale, ksize):
    """col2im fold of conv_transpose2d(stride=scale, padding=scale, kernel=scale*ksize).
    z: (H*W, C*K*K) -> (C, scale*H, scale*W)."""
    zr = z.reshape(H, W, C, ksize, scale, ksize, scale)
    full_h = scale * (H + ksize - 1)
    full_w = scale * (W + ksize - 1)
    out = jnp.zeros((C, full_h, full_w), jnp.float32)
    for qh in range(ksize):
        for qw in range(ksize):
            blk = zr[:, :, :, qh, :, qw, :]                    # (H,W,C,scale,scale)
            blk = jnp.transpose(blk, (2, 0, 3, 1, 4)).reshape(C, scale * H, scale * W)
            out = out.at[:, scale * qh:scale * qh + scale * H,
                         scale * qw:scale * qw + scale * W].add(blk)
    return out[:, scale:scale + scale * H, scale:scale + scale * W]


# --------------------------- forward pass ------------------------------------

def cross_scale_attention_forward(x, params):
    N, C, H, W = x.shape
    assert H % SCALE == 0 and W % SCALE == 0 and C % REDUCTION == 0
    Cr = C // REDUCTION
    K = SCALE * KSIZE
    Hr, Wr = H // SCALE, W // SCALE
    L = Hr * Wr

    x_rows = jnp.transpose(x, (0, 2, 3, 1)).reshape(N * H * W, C)

    # conv_match_1 + conv_assembly share the same LHS -> fuse into one Pallas
    # matmul (concat Cout), halving kernel launches and LHS HBM traffic.
    # PReLU(num_parameters=1) per branch -> per-column alpha vector here.
    w_f = jnp.concatenate([params["m1_w"], params["asm_w"]], axis=1)     # (C, Cr+C)
    b_f = jnp.concatenate([params["m1_b"], params["asm_b"]], axis=0)
    a_f = jnp.concatenate([jnp.full((Cr,), params["m1_a"], jnp.float32),
                           jnp.full((C,), params["asm_a"], jnp.float32)])
    fused = conv1x1_prelu(x_rows, w_f, b_f, a_f)
    match_rows, embed_rows = fused[:, :Cr], fused[:, Cr:]
    match_input = jnp.transpose(match_rows.reshape(N, H, W, Cr), (0, 3, 1, 2))
    embed_w = jnp.transpose(embed_rows.reshape(N, H, W, C), (0, 3, 1, 2))

    # ref = conv_match_2(bilinear_downsample(input, 1/scale))
    ref_in = bilinear_downsample(x, SCALE)
    ref_rows = jnp.transpose(ref_in, (0, 2, 3, 1)).reshape(N * Hr * Wr, C)
    ref_feat = conv1x1_prelu(ref_rows, params["m2_w"], params["m2_b"],
                             jnp.full((Cr,), params["m2_a"], jnp.float32))
    ref = jnp.transpose(ref_feat.reshape(N, Hr, Wr, Cr), (0, 3, 1, 2))

    # Patch extraction (vmapped over batch, no Python per-batch loops).
    x_cols = extract_patches_b(same_pad(match_input, KSIZE, 1), KSIZE, 1)        # (N,HW,Cr*9)
    w_match = extract_patches_b(same_pad(ref, KSIZE, STRIDE), KSIZE, STRIDE)     # (N,L,Cr*9)
    w_asm = extract_patches_b(same_pad(embed_w, K, STRIDE * SCALE),
                              K, STRIDE * SCALE)                                 # (N,L,C*81)

    # Hoist the L2 normalization (escape_NaN clamp) out of the kernel, fold the
    # softmax_scale into the normalized kernels, and pre-transpose so the
    # correlation matmul feeds the MXU in plain (M,K)@(K,N) orientation.
    nrm = jnp.sqrt(jnp.sum(w_match * w_match, axis=-1, keepdims=True))
    w_mn = w_match / jnp.maximum(nrm, ESCAPE_NAN)
    w_match_t = jnp.transpose(w_mn * SOFTMAX_SCALE, (0, 2, 1))                   # (N,CK,L)

    z = cross_scale_attn_core(x_cols.astype(jnp.bfloat16),
                              w_match_t.astype(jnp.bfloat16),
                              w_asm.astype(jnp.bfloat16))                        # (N,HW,C*81)

    # col2im fold of the transposed conv (vmapped over batch).
    return jax.vmap(lambda zb: fold_transposed(zb, C, H, W, SCALE, KSIZE))(z)


def init_params(key, channel, reduction):
    Cr = channel // reduction
    ks = jax.random.split(key, 6)

    def w(k, ci, co):
        return jax.random.normal(k, (ci, co), jnp.float32) / jnp.sqrt(jnp.float32(ci))

    def b(k, co):
        return jax.random.normal(k, (co,), jnp.float32) * 0.01

    return dict(
        m1_w=w(ks[0], channel, Cr), m1_b=b(ks[1], Cr), m1_a=jnp.float32(0.25),
        m2_w=w(ks[2], channel, Cr), m2_b=b(ks[3], Cr), m2_a=jnp.float32(0.25),
        asm_w=w(ks[4], channel, channel), asm_b=b(ks[5], channel),
        asm_a=jnp.float32(0.25),
    )


if __name__ == "__main__":
    key = jax.random.PRNGKey(0)
    kx, kp = jax.random.split(key)
    N, C, H, W = 2, CHANNEL, 12, 12
    x = jax.random.normal(kx, (N, C, H, W), jnp.float32)
    params = init_params(kp, CHANNEL, REDUCTION)

    fwd = jax.jit(cross_scale_attention_forward)
    out = fwd(x, params)
    out = jax.block_until_ready(out)

    assert out.shape == (N, C, SCALE * H, SCALE * W), out.shape
    assert bool(jnp.all(jnp.isfinite(out)))
    print("KERNEL_OK")
</pallas_src>

<mosaic_0001>
module attributes {stable_mosaic.version = 11 : i64} {
  func.func @_conv1x1_prelu_kernel(%arg0: i32, %arg1: memref<32x8xf32, #tpu.memory_space<vmem>>, %arg2: memref<8x4xf32, #tpu.memory_space<vmem>>, %arg3: memref<1x4xf32, #tpu.memory_space<vmem>>, %arg4: memref<1x4xf32, #tpu.memory_space<vmem>>, %arg5: memref<32x4xf32, #tpu.memory_space<vmem>>) attributes {dimension_semantics = [#tpu.dimension_semantics<parallel>], iteration_bounds = array<i64: 1>, scalar_prefetch = 0 : i64, scratch_operands = 0 : i64, tpu.core_type = #tpu.core_type<tc>, window_params = [{transform_indices = @transform_0, window_bounds = array<i64: 32, 8>}, {pipeline_mode = #tpu.pipeline_mode<synchronous>, transform_indices = @transform_1, window_bounds = array<i64: 8, 4>}, {pipeline_mode = #tpu.pipeline_mode<synchronous>, transform_indices = @transform_2, window_bounds = array<i64: 1, 4>}, {pipeline_mode = #tpu.pipeline_mode<synchronous>, transform_indices = @transform_3, window_bounds = array<i64: 1, 4>}, {transform_indices = @transform_4, window_bounds = array<i64: 32, 4>}]} {
    %c0 = arith.constant 0 : index
    %c0_0 = arith.constant 0 : index
    %0 = vector.load %arg1[%c0, %c0_0] : memref<32x8xf32, #tpu.memory_space<vmem>>, vector<32x8xf32>
    %c0_1 = arith.constant 0 : index
    %c0_2 = arith.constant 0 : index
    %1 = vector.load %arg2[%c0_1, %c0_2] : memref<8x4xf32, #tpu.memory_space<vmem>>, vector<8x4xf32>
    %cst = arith.constant dense<0.000000e+00> : vector<32x4xf32>
    %2 = tpu.matmul %0, %1, %cst {dimension_numbers = #tpu.dot_dimension_numbers<[1], [0], [0], [1], [0, 0, 1, 1], [], []>} : vector<32x8xf32>, vector<8x4xf32>, vector<32x4xf32> -> vector<32x4xf32>
    %c0_3 = arith.constant 0 : index
    %c0_4 = arith.constant 0 : index
    %3 = vector.load %arg3[%c0_3, %c0_4] : memref<1x4xf32, #tpu.memory_space<vmem>>, vector<1x4xf32>
    %4 = vector.broadcast %3 : vector<1x4xf32> to vector<32x4xf32>
    %5 = arith.addf %2, %4 : vector<32x4xf32>
    %cst_5 = arith.constant 0.000000e+00 : f32
    %6 = vector.broadcast %cst_5 : f32 to vector<32x4xf32>
    %7 = arith.cmpf oge, %5, %6 : vector<32x4xf32>
    %c0_6 = arith.constant 0 : index
    %c0_7 = arith.constant 0 : index
    %8 = vector.load %arg4[%c0_6, %c0_7] : memref<1x4xf32, #tpu.memory_space<vmem>>, vector<1x4xf32>
    %9 = vector.broadcast %8 : vector<1x4xf32> to vector<32x4xf32>
    %10 = arith.mulf %9, %5 : vector<32x4xf32>
    %11 = arith.select %7, %5, %10 : vector<32x4xi1>, vector<32x4xf32>
    %c0_8 = arith.constant 0 : index
    %c0_9 = arith.constant 0 : index
    %12 = vector.load %arg5[%c0_8, %c0_9] : memref<32x4xf32, #tpu.memory_space<vmem>>, vector<32x4xf32>
    tpu.vector_store %arg5[%c0_8, %c0_9], %11 {strides = array<i32>} : memref<32x4xf32, #tpu.memory_space<vmem>>, vector<32x4xf32>,
    return
  }
  func.func @transform_0(%arg0: i32) -> (i32, i32) {
    %c0_i32 = arith.constant 0 : i32
    %c0_i32_0 = arith.constant 0 : i32
    return %arg0, %c0_i32 : i32, i32
  }
  func.func @transform_1(%arg0: i32) -> (i32, i32) {
    %c0_i32 = arith.constant 0 : i32
    %c0_i32_0 = arith.constant 0 : i32
    %c0_i32_1 = arith.constant 0 : i32
    return %c0_i32, %c0_i32_0 : i32, i32
  }
  func.func @transform_2(%arg0: i32) -> (i32, i32) {
    %c0_i32 = arith.constant 0 : i32
    %c0_i32_0 = arith.constant 0 : i32
    %c0_i32_1 = arith.constant 0 : i32
    return %c0_i32, %c0_i32_0 : i32, i32
  }
  func.func @transform_3(%arg0: i32) -> (i32, i32) {
    %c0_i32 = arith.constant 0 : i32
    %c0_i32_0 = arith.constant 0 : i32
    %c0_i32_1 = arith.constant 0 : i32
    return %c0_i32, %c0_i32_0 : i32, i32
  }
  func.func @transform_4(%arg0: i32) -> (i32, i32) {
    %c0_i32 = arith.constant 0 : i32
    %c0_i32_0 = arith.constant 0 : i32
    return %arg0, %c0_i32 : i32, i32
  }
}

module attributes {stable_mosaic.version = 11 : i64} {
  func.func @_conv1x1_prelu_kernel(%arg0: i32, %arg1: memref<288x8xf32, #tpu.memory_space<vmem>>, %arg2: memref<8x12xf32, #tpu.memory_space<vmem>>, %arg3: memref<1x12xf32, #tpu.memory_space<vmem>>, %arg4: memref<1x12xf32, #tpu.memory_space<vmem>>, %arg5: memref<288x12xf32, #tpu.memory_space<vmem>>) attributes {dimension_semantics = [#tpu.dimension_semantics<parallel>], iteration_bounds = array<i64: 1>, scalar_prefetch = 0 : i64, scratch_operands = 0 : i64, tpu.core_type = #tpu.core_type<tc>, window_params = [{transform_indices = @transform_0, window_bounds = array<i64: 288, 8>}, {pipeline_mode = #tpu.pipeline_mode<synchronous>, transform_indices = @transform_1, window_bounds = array<i64: 8, 12>}, {pipeline_mode = #tpu.pipeline_mode<synchronous>, transform_indices = @transform_2, window_bounds = array<i64: 1, 12>}, {pipeline_mode = #tpu.pipeline_mode<synchronous>, transform_indices = @transform_3, window_bounds = array<i64: 1, 12>}, {transform_indices = @transform_4, window_bounds = array<i64: 288, 12>}]} {
    %c0 = arith.constant 0 : index
    %c0_0 = arith.constant 0 : index
    %0 = vector.load %arg1[%c0, %c0_0] : memref<288x8xf32, #tpu.memory_space<vmem>>, vector<288x8xf32>
    %c0_1 = arith.constant 0 : index
    %c0_2 = arith.constant 0 : index
    %1 = vector.load %arg2[%c0_1, %c0_2] : memref<8x12xf32, #tpu.memory_space<vmem>>, vector<8x12xf32>
    %cst = arith.constant dense<0.000000e+00> : vector<288x12xf32>
    %2 = tpu.matmul %0, %1, %cst {dimension_numbers = #tpu.dot_dimension_numbers<[1], [0], [0], [1], [0, 0, 1, 1], [], []>} : vector<288x8xf32>, vector<8x12xf32>, vector<288x12xf32> -> vector<288x12xf32>
    %c0_3 = arith.constant 0 : index
    %c0_4 = arith.constant 0 : index
    %3 = vector.load %arg3[%c0_3, %c0_4] : memref<1x12xf32, #tpu.memory_space<vmem>>, vector<1x12xf32>
    %4 = vector.broadcast %3 : vector<1x12xf32> to vector<288x12xf32>
    %5 = arith.addf %2, %4 : vector<288x12xf32>
    %cst_5 = arith.constant 0.000000e+00 : f32
    %6 = vector.broadcast %cst_5 : f32 to vector<288x12xf32>
    %7 = arith.cmpf oge, %5, %6 : vector<288x12xf32>
    %c0_6 = arith.constant 0 : index
    %c0_7 = arith.constant 0 : index
    %8 = vector.load %arg4[%c0_6, %c0_7] : memref<1x12xf32, #tpu.memory_space<vmem>>, vector<1x12xf32>
    %9 = vector.broadcast %8 : vector<1x12xf32> to vector<288x12xf32>
    %10 = arith.mulf %9, %5 : vector<288x12xf32>
    %11 = arith.select %7, %5, %10 : vector<288x12xi1>, vector<288x12xf32>
    %c0_8 = arith.constant 0 : index
    %c0_9 = arith.constant 0 : index
    %12 = vector.load %arg5[%c0_8, %c0_9] : memref<288x12xf32, #tpu.memory_space<vmem>>, vector<288x12xf32>
    tpu.vector_store %arg5[%c0_8, %c0_9], %11 {strides = array<i32>} : memref<288x12xf32, #tpu.memory_space<vmem>>, vector<288x12xf32>,
    return
  }
  func.func @transform_0(%arg0: i32) -> (i32, i32) {
    %c0_i32 = arith.constant 0 : i32
    %c0_i32_0 = arith.constant 0 : i32
    return %arg0, %c0_i32 : i32, i32
  }
  func.func @transform_1(%arg0: i32) -> (i32, i32) {
    %c0_i32 = arith.constant 0 : i32
    %c0_i32_0 = arith.constant 0 : i32
    %c0_i32_1 = arith.constant 0 : i32
    return %c0_i32, %c0_i32_0 : i32, i32
  }
  func.func @transform_2(%arg0: i32) -> (i32, i32) {
    %c0_i32 = arith.constant 0 : i32
    %c0_i32_0 = arith.constant 0 : i32
    %c0_i32_1 = arith.constant 0 : i32
    return %c0_i32, %c0_i32_0 : i32, i32
  }
  func.func @transform_3(%arg0: i32) -> (i32, i32) {
    %c0_i32 = arith.constant 0 : i32
    %c0_i32_0 = arith.constant 0 : i32
    %c0_i32_1 = arith.constant 0 : i32
    return %c0_i32, %c0_i32_0 : i32, i32
  }
  func.func @transform_4(%arg0: i32) -> (i32, i32) {
    %c0_i32 = arith.constant 0 : i32
    %c0_i32_0 = arith.constant 0 : i32
    return %arg0, %c0_i32 : i32, i32
  }
}

module attributes {stable_mosaic.version = 11 : i64} {
  func.func @_cross_scale_attn_kernel(%arg0: i32, %arg1: i32, %arg2: i32, %arg3: memref<1x144x36xbf16, #tpu.memory_space<vmem>>, %arg4: memref<1x36x16xbf16, #tpu.memory_space<vmem>>, %arg5: memref<1x16x768xbf16, #tpu.memory_space<vmem>>, %arg6: memref<1x144x768xf32, #tpu.memory_space<vmem>>, %arg7: memref<144x16xbf16, #tpu.memory_space<vmem>>) attributes {dimension_semantics = [#tpu.dimension_semantics<parallel>, #tpu.dimension_semantics<parallel>, #tpu.dimension_semantics<arbitrary>], iteration_bounds = array<i64: 2, 1, 1>, scalar_prefetch = 0 : i64, scratch_operands = 1 : i64, tpu.core_type = #tpu.core_type<tc>, window_params = [{transform_indices = @transform_0, window_bounds = array<i64: 1, 144, 36>}, {transform_indices = @transform_1, window_bounds = array<i64: 1, 36, 16>}, {transform_indices = @transform_2, window_bounds = array<i64: 1, 16, 768>}, {transform_indices = @transform_3, window_bounds = array<i64: 1, 144, 768>}]} {
    %c0_i32 = arith.constant 0 : i32
    %0 = arith.cmpi eq, %arg2, %c0_i32 : i32
    %1 = arith.extui %0 : i1 to i32
    %c0_i32_0 = arith.constant 0 : i32
    %2 = arith.cmpi ne, %1, %c0_i32_0 : i32
    scf.if %2 {
      %c0_8 = arith.constant 0 : index
      %c0_9 = arith.constant 0 : index
      %c0_10 = arith.constant 0 : index
      %10 = vector.load %arg3[%c0_8, %c0_9, %c0_10] : memref<1x144x36xbf16, #tpu.memory_space<vmem>>, vector<1x144x36xbf16>
      %11 = vector.shape_cast %10 : vector<1x144x36xbf16> to vector<144x36xbf16>
      %c0_11 = arith.constant 0 : index
      %c0_12 = arith.constant 0 : index
      %c0_13 = arith.constant 0 : index
      %12 = vector.load %arg4[%c0_11, %c0_12, %c0_13] : memref<1x36x16xbf16, #tpu.memory_space<vmem>>, vector<1x36x16xbf16>
      %13 = vector.shape_cast %12 : vector<1x36x16xbf16> to vector<36x16xbf16>
      %cst_14 = arith.constant dense<0.000000e+00> : vector<144x16xf32>
      %14 = tpu.matmul %11, %13, %cst_14 {dimension_numbers = #tpu.dot_dimension_numbers<[1], [0], [0], [1], [0, 0, 1, 1], [], []>} : vector<144x36xbf16>, vector<36x16xbf16>, vector<144x16xf32> -> vector<144x16xf32>
      %cst_15 = arith.constant dense<0xFF800000> : vector<144xf32>
      %15 = vector.multi_reduction <maximumf>, %14, %cst_15 [1] : vector<144x16xf32> to vector<144xf32>
      %16 = vector.shape_cast %15 : vector<144xf32> to vector<144x1xf32>
      %17 = vector.broadcast %16 : vector<144x1xf32> to vector<144x16xf32>
      %18 = arith.subf %14, %17 : vector<144x16xf32>
      %19 = math.exp %18 : vector<144x16xf32>
      %cst_16 = arith.constant dense<0.000000e+00> : vector<144xf32>
      %20 = vector.multi_reduction <add>, %19, %cst_16 [1] : vector<144x16xf32> to vector<144xf32>
      %21 = vector.shape_cast %20 : vector<144xf32> to vector<144x1xf32>
      %cst_17 = arith.constant 6.000000e+00 : f32
      %22 = vector.broadcast %cst_17 : f32 to vector<144x1xf32>
      %23 = arith.mulf %22, %21 : vector<144x1xf32>
      %24 = tpu.reciprocal %23 {approx = true} : vector<144x1xf32> -> vector<144x1xf32>
      %25 = vector.broadcast %24 : vector<144x1xf32> to vector<144x16xf32>
      %26 = arith.mulf %19, %25 : vector<144x16xf32>
      %27 = arith.truncf %26 : vector<144x16xf32> to vector<144x16xbf16>
      %c0_18 = arith.constant 0 : index
      %c0_19 = arith.constant 0 : index
      %28 = vector.load %arg7[%c0_18, %c0_19] : memref<144x16xbf16, #tpu.memory_space<vmem>>, vector<144x16xbf16>
      tpu.vector_store %arg7[%c0_18, %c0_19], %27 {strides = array<i32>} : memref<144x16xbf16, #tpu.memory_space<vmem>>, vector<144x16xbf16>,
    } else {
    }
    %c0 = arith.constant 0 : index
    %c0_1 = arith.constant 0 : index
    %3 = vector.load %arg7[%c0, %c0_1] : memref<144x16xbf16, #tpu.memory_space<vmem>>, vector<144x16xbf16>
    %c0_2 = arith.constant 0 : index
    %c0_3 = arith.constant 0 : index
    %c0_4 = arith.constant 0 : index
    %4 = vector.load %arg5[%c0_2, %c0_3, %c0_4] : memref<1x16x768xbf16, #tpu.memory_space<vmem>>, vector<1x16x768xbf16>
    %5 = vector.shape_cast %4 : vector<1x16x768xbf16> to vector<16x768xbf16>
    %cst = arith.constant dense<0.000000e+00> : vector<144x768xf32>
    %6 = tpu.matmul %3, %5, %cst {dimension_numbers = #tpu.dot_dimension_numbers<[1], [0], [0], [1], [0, 0, 1, 1], [], []>} : vector<144x16xbf16>, vector<16x768xbf16>, vector<144x768xf32> -> vector<144x768xf32>
    %c0_5 = arith.constant 0 : index
    %c0_6 = arith.constant 0 : index
    %c0_7 = arith.constant 0 : index
    %7 = vector.load %arg6[%c0_5, %c0_6, %c0_7] : memref<1x144x768xf32, #tpu.memory_space<vmem>>, vector<1x144x768xf32>
    %8 = vector.shape_cast %7 : vector<1x144x768xf32> to vector<144x768xf32>
    %9 = vector.shape_cast %6 : vector<144x768xf32> to vector<1x144x768xf32>
    tpu.vector_store %arg6[%c0_5, %c0_6, %c0_7], %9 {strides = array<i32>} : memref<1x144x768xf32, #tpu.memory_space<vmem>>, vector<1x144x768xf32>,
    return
  }
  func.func @transform_0(%arg0: i32, %arg1: i32, %arg2: i32) -> (i32, i32, i32) {
    %c0_i32 = arith.constant 0 : i32
    %c0_i32_0 = arith.constant 0 : i32
    return %arg0, %arg1, %c0_i32 : i32, i32, i32
  }
  func.func @transform_1(%arg0: i32, %arg1: i32, %arg2: i32) -> (i32, i32, i32) {
    %c0_i32 = arith.constant 0 : i32
    %c0_i32_0 = arith.constant 0 : i32
    %c0_i32_1 = arith.constant 0 : i32
    return %arg0, %c0_i32, %c0_i32_0 : i32, i32, i32
  }
  func.func @transform_2(%arg0: i32, %arg1: i32, %arg2: i32) -> (i32, i32, i32) {
    %c0_i32 = arith.constant 0 : i32
    %c0_i32_0 = arith.constant 0 : i32
    return %arg0, %c0_i32, %arg2 : i32, i32, i32
  }
  func.func @transform_3(%arg0: i32, %arg1: i32, %arg2: i32) -> (i32, i32, i32) {
    %c0_i32 = arith.constant 0 : i32
    return %arg0, %arg1, %arg2 : i32, i32, i32
  }
}

</mosaic_0001>

<bundles_post_ra>
// kernel: cross_scale_attention_forward.4
= control target key start
LH: loop header
LB: loop body
LE: loop exit
PB: predicated region body
PF: predicated region fallthrough
CT: control target
= control target key end

     0   :  { %9 = vsyncpa [#allocation3], 0  ;;  %s214_s15 = smov [#allocation2]   ;;  %s286_s0 = inlined_call_operand.vmem [shape: f32[32,8], index: 0, kind: input, shape index: {}]   ;;  %s287_s1 = inlined_call_operand.vmem [shape: f32[8,4], index: 1, kind: input, shape index: {}]   ;;  %s288_s2 = inlined_call_operand.hbm [shape: f32[1,4], index: 2, kind: input, shape index: {}]   ;;  %s289_s3 = inlined_call_operand.vmem [shape: f32[1,4], index: 3, kind: input, shape index: {}]   ;;  %s290_s4 = inlined_call_operand.vmem [shape: f32[32,4], index: 4, kind: output, shape index: {}]  }
   0x1   :  { %s20_s16 = sshll.u32 %s214_s15, 4  ;;  %s190_s19 = scalar_lea.hbm %s288_s2, 16  ;;  %s21_s16 = int_to_ptr.vmem [resolvable:$true] %s20_s16 }
   0x2   :  { %p191_p0 = scmp.ne.s32.totalorder %s288_s2, %s190_s19  ;;  %p194_p1 = scmp.lt.u32.totalorder %s190_s19, %s288_s2 }
   0x4   :  { %p196_p2 = pnand %p194_p1, %p191_p0 }
   0x6   :  { %199 = shalt.err (!%p196_p2)
}
   0x7   :  { %s200_s24 = scalar_lea.vmem %s21_s16, 16  ;;  %s204_s25 = scalar_lea.vmem %s21_s16, 32 }
   0x8   :  { %p201_p3 = scmp.ne.s32.totalorder %s21_s16, %s200_s24  ;;  %p205_p4 = scmp.lt.s32.totalorder %s21_s16, %s21_s16 }
   0x9   :  { %p206_p5 = scmp.lt.s32.totalorder %s204_s25, %s200_s24 }
   0xb   :  { %p207_p6 = por %p206_p5, %p205_p4 }
   0xd   :  { %p208_p7 = pnand %p207_p6, %p201_p3 }
   0xf   :  { %211 = shalt.err (!%p208_p7)
}
  0x10   :  { %23 = dma.hbm_to_vmem [thread:$0]  %s288_s2, 16, %s21_s16, [#allocation3]  }
  0x11   :  { %212 = dma.done.wait [#allocation3], 16  }
  0x12   :  { %213 = vsyncadd [#allocation3], 4294967280  ;;  %v33_v0 = vld [vmem:[%s287_s1] sm:$0xff]  ;;  %vm41_vm0 = vcmask 64512   ;;  %v31_v2 = vld [vmem:[%s286_s0 + $0x10] sm:$0xff]  ;;  %vm158_vm1 = vcmask 31744  }
  0x13   :  { %v29_v1 = vld [vmem:[%s286_s0] sm:$0xff]  ;;  %179 = vmatprep.subr.mxu0 %v33_v0  ;;  %187 = vmatprep.subr.mxu1 %v33_v0  ;;  %v30_v3 = vld [vmem:[%s286_s0 + $0x8] sm:$0xff]  ;;  %v32_v4 = vld [vmem:[%s286_s0 + $0x18] sm:$0xff] }
  0x14   :  { %180 = vmatpush3.msra.mxu0 %v33_v0  ;;  %188 = vmatpush3.msra.mxu1 %v33_v0  ;;  %v168_v5 = vld [vmem:[#allocation2] ss:$0 sm:$0xff] }
  0x15   :  { %181 = vmatprep.mubr.msk.f32.mxu0 %vm41_vm0, %v29_v1  ;;  %184 = vmatprep.mubr.msk.f32.mxu1 %vm41_vm0, %v31_v2  ;;  %v173_v7 = vld [vmem:[%s289_s3] ss:$0 sm:$0xff] }
  0x16   :  { %182 = vmatmul.mubr.msk.f32.vlgmr.msra.gmra.mrb[0].mxu0 %vm41_vm0, %v30_v3  ;;  %185 = vmatmul.mubr.msk.f32.vlgmr.msra.gmra.mrb[0].mxu1 %vm41_vm0, %v32_v4 }
  0xe9   :  { %v183_v6 = vpop.f32.mrb[0].mxu0  ;;  %v186_v8 = vpop.f32.mrb[0].mxu1 }
  0xea   :  { %v126_v9 = vadd.f32 %v183_v6, %v168_v5  ;;  %v136_v10 = vadd.f32 %v186_v8, %v168_v5  ;;  %v120_v11 = vpop.f32.mrb[1].mxu0  ;;  %v130_v12 = vpop.f32.mrb[1].mxu1 }
  0xeb   :  { %v121_v13 = vadd.f32 %v168_v5, %v120_v11  ;;  %v131_v14 = vadd.f32 %v168_v5, %v130_v12 }
  0xec   :  { %vm140_vm2 = vcmp.ge.f32.partialorder %v126_v9, 0.0  ;;  %v151_v15 = vmul.f32 %v173_v7, %v126_v9  ;;  %vm142_vm3 = vcmp.ge.f32.partialorder %v136_v10, 0.0  ;;  %v153_v16 = vmul.f32 %v173_v7, %v136_v10 }
  0xed   :  { %vm139_vm4 = vcmp.ge.f32.partialorder %v121_v13, 0.0  ;;  %v150_v17 = vmul.f32 %v173_v7, %v121_v13  ;;  %vm141_vm5 = vcmp.ge.f32.partialorder %v131_v14, 0.0  ;;  %v152_v18 = vmul.f32 %v173_v7, %v131_v14 }
  0xee   :  { %v155_v19 = vsel %vm140_vm2, %v126_v9, %v151_v15  ;;  %v157_v20 = vsel %vm142_vm3, %v136_v10, %v153_v16 }
  0xef   :  { %160 = vst.msk [vmem:[%s290_s4 + $0x8] sm:$0xff] %vm158_vm1, %v155_v19  ;;  %162 = vst.msk [vmem:[%s290_s4 + $0x18] sm:$0xff] %vm158_vm1, %v157_v20  ;;  %v154_v21 = vsel %vm139_vm4, %v121_v13, %v150_v17  ;;  %v156_v22 = vsel %vm141_vm5, %v131_v14, %v152_v18 }
  0xf0   :  { %159 = vst.msk [vmem:[%s290_s4] sm:$0xff] %vm158_vm1, %v154_v21  ;;  %161 = vst.msk [vmem:[%s290_s4 + $0x10] sm:$0xff] %vm158_vm1, %v156_v22 }
  0xf1   :  { %167 = vsyncpa [#allocation3], 1 }

// kernel: cross_scale_attention_forward.3
= control target key start
LH: loop header
LB: loop body
LE: loop exit
PB: predicated region body
PF: predicated region fallthrough
CT: control target
= control target key end

     0   :  { %vm61_vm0 = vcmask 64512   ;;  %vm530_vm1 = vcmask 97280   ;;  %s1102_s1 = inlined_call_operand.vmem [shape: f32[8,12], index: 1, kind: input, shape index: {}]   ;;  %s1103_s0 = inlined_call_operand.vmem [shape: f32[288,8], index: 0, kind: input, shape index: {}]   ;;  %s1104_s2 = inlined_call_operand.vmem [shape: f32[1,12], index: 2, kind: input, shape index: {}]   ;;  %s1105_s3 = inlined_call_operand.vmem [shape: f32[1,12], index: 3, kind: input, shape index: {}]   ;;  %s1106_s4 = inlined_call_operand.vmem [shape: f32[288,12], index: 4, kind: output, shape index: {}]  }
   0x1   :  { %v53_v0 = vld [vmem:[%s1102_s1] sm:$0xff]  ;;  %v35_v2 = vld [vmem:[%s1103_s0 + $0x90] sm:$0xff]  ;;  %v18_v3 = vld [vmem:[%s1103_s0 + $0x8] sm:$0xff] }
   0x2   :  { %v17_v1 = vld [vmem:[%s1103_s0] sm:$0xff]  ;;  %646 = vmatprep.subr.mxu0 %v53_v0  ;;  %702 = vmatprep.subr.mxu1 %v53_v0  ;;  %v36_v4 = vld [vmem:[%s1103_s0 + $0x98] sm:$0xff]  ;;  %v19_v5 = vld [vmem:[%s1103_s0 + $0x10] sm:$0xff] }
   0x3   :  { %647 = vmatpush3.msra.mxu0 %v53_v0  ;;  %703 = vmatpush3.msra.mxu1 %v53_v0  ;;  %v37_v6 = vld [vmem:[%s1103_s0 + $0xa0] sm:$0xff]  ;;  %v20_v7 = vld [vmem:[%s1103_s0 + $0x18] sm:$0xff]  ;;  %v38_v8 = vld [vmem:[%s1103_s0 + $0xa8] sm:$0xff] }
   0x4   :  { %648 = vmatprep.mubr.msk.f32.mxu0 %vm61_vm0, %v17_v1  ;;  %675 = vmatprep.mubr.msk.f32.mxu1 %vm61_vm0, %v35_v2  ;;  %v21_v9 = vld [vmem:[%s1103_s0 + $0x20] sm:$0xff]  ;;  %v39_v10 = vld [vmem:[%s1103_s0 + $0xb0] sm:$0xff]  ;;  %v22_v11 = vld [vmem:[%s1103_s0 + $0x28] sm:$0xff] }
   0x5   :  { %649 = vmatmul.mubr.msk.f32.vlgmr.msra.gmra.mrb[0].mxu0 %vm61_vm0, %v18_v3  ;;  %676 = vmatmul.mubr.msk.f32.vlgmr.msra.gmra.mrb[0].mxu1 %vm61_vm0, %v36_v4  ;;  %v40_v12 = vld [vmem:[%s1103_s0 + $0xb8] sm:$0xff]  ;;  %v23_v13 = vld [vmem:[%s1103_s0 + $0x30] sm:$0xff]  ;;  %v41_v14 = vld [vmem:[%s1103_s0 + $0xc0] sm:$0xff] }
   0x6   :  { %651 = vmatprep.mubr.msk.f32.mxu0 %vm61_vm0, %v19_v5  ;;  %678 = vmatprep.mubr.msk.f32.mxu1 %vm61_vm0, %v37_v6  ;;  %v24_v15 = vld [vmem:[%s1103_s0 + $0x38] sm:$0xff]  ;;  %v42_v16 = vld [vmem:[%s1103_s0 + $0xc8] sm:$0xff]  ;;  %v25_v17 = vld [vmem:[%s1103_s0 + $0x40] sm:$0xff] }
   0x7   :  { %v43_v18 = vld [vmem:[%s1103_s0 + $0xd0] sm:$0xff]  ;;  %v26_v19 = vld [vmem:[%s1103_s0 + $0x48] sm:$0xff]  ;;  %v44_v20 = vld [vmem:[%s1103_s0 + $0xd8] sm:$0xff] }
   0x8   :  { %v27_v21 = vld [vmem:[%s1103_s0 + $0x50] sm:$0xff]  ;;  %v45_v22 = vld [vmem:[%s1103_s0 + $0xe0] sm:$0xff]  ;;  %v28_v23 = vld [vmem:[%s1103_s0 + $0x58] sm:$0xff] }
   0x9   :  { %652 = vmatmul.mubr.msk.f32.gmra.mrb[2].mxu0 %vm61_vm0, %v20_v7  ;;  %679 = vmatmul.mubr.msk.f32.gmra.mrb[2].mxu1 %vm61_vm0, %v38_v8  ;;  %v46_v24 = vld [vmem:[%s1103_s0 + $0xe8] sm:$0xff]  ;;  %v29_v25 = vld [vmem:[%s1103_s0 + $0x60] sm:$0xff]  ;;  %v47_v26 = vld [vmem:[%s1103_s0 + $0xf0] sm:$0xff] }
   0xa   :  { %654 = vmatprep.mubr.msk.f32.mxu0 %vm61_vm0, %v21_v9  ;;  %681 = vmatprep.mubr.msk.f32.mxu1 %vm61_vm0, %v39_v10  ;;  %v30_v27 = vld [vmem:[%s1103_s0 + $0x68] sm:$0xff]  ;;  %v48_v28 = vld [vmem:[%s1103_s0 + $0xf8] sm:$0xff]  ;;  %v31_v29 = vld [vmem:[%s1103_s0 + $0x70] sm:$0xff] }
   0xb   :  { %v49_v30 = vld [vmem:[%s1103_s0 + $0x100] sm:$0xff]  ;;  %v32_v31 = vld [vmem:[%s1103_s0 + $0x78] sm:$0xff]  ;;  %v50_v32 = vld [vmem:[%s1103_s0 + $0x108] sm:$0xff] }
   0xc   :  { %v33_v33 = vld [vmem:[%s1103_s0 + $0x80] sm:$0xff]  ;;  %v51_v34 = vld [vmem:[%s1103_s0 + $0x110] sm:$0xff]  ;;  %v34_v35 = vld [vmem:[%s1103_s0 + $0x88] sm:$0xff] }
   0xd   :  { %655 = vmatmul.mubr.msk.f32.gmra.mrb[4].mxu0 %vm61_vm0, %v22_v11  ;;  %682 = vmatmul.mubr.msk.f32.gmra.mrb[4].mxu1 %vm61_vm0, %v40_v12  ;;  %v52_v36 = vld [vmem:[%s1103_s0 + $0x118] sm:$0xff]  ;;  %v879_v37 = vld [vmem:[%s1104_s2] ss:$0 sm:$0xff] }
   0xe   :  { %657 = vmatprep.mubr.msk.f32.mxu0 %vm61_vm0, %v23_v13  ;;  %684 = vmatprep.mubr.msk.f32.mxu1 %vm61_vm0, %v41_v14  ;;  %v884_v39 = vld [vmem:[%s1105_s3] ss:$0 sm:$0xff] }
  0x11   :  { %658 = vmatmul.mubr.msk.f32.gmra.mrb[6].mxu0 %vm61_vm0, %v24_v15  ;;  %685 = vmatmul.mubr.msk.f32.gmra.mrb[6].mxu1 %vm61_vm0, %v42_v16 }
  0x12   :  { %660 = vmatprep.mubr.msk.f32.mxu0 %vm61_vm0, %v25_v17  ;;  %687 = vmatprep.mubr.msk.f32.mxu1 %vm61_vm0, %v43_v18 }
  0x15   :  { %661 = vmatmul.mubr.msk.f32.gmra.mrb[8].mxu0 %vm61_vm0, %v26_v19  ;;  %688 = vmatmul.mubr.msk.f32.gmra.mrb[8].mxu1 %vm61_vm0, %v44_v20 }
  0x16   :  { %663 = vmatprep.mubr.msk.f32.mxu0 %vm61_vm0, %v27_v21  ;;  %690 = vmatprep.mubr.msk.f32.mxu1 %vm61_vm0, %v45_v22 }
  0x19   :  { %664 = vmatmul.mubr.msk.f32.gmra.mrb[10].mxu0 %vm61_vm0, %v28_v23  ;;  %691 = vmatmul.mubr.msk.f32.gmra.mrb[10].mxu1 %vm61_vm0, %v46_v24 }
  0x1a   :  { %666 = vmatprep.mubr.msk.f32.mxu0 %vm61_vm0, %v29_v25  ;;  %693 = vmatprep.mubr.msk.f32.mxu1 %vm61_vm0, %v47_v26 }
  0x1d   :  { %667 = vmatmul.mubr.msk.f32.gmra.mrb[12].mxu0 %vm61_vm0, %v30_v27  ;;  %694 = vmatmul.mubr.msk.f32.gmra.mrb[12].mxu1 %vm61_vm0, %v48_v28 }
  0x1e   :  { %669 = vmatprep.mubr.msk.f32.mxu0 %vm61_vm0, %v31_v29  ;;  %696 = vmatprep.mubr.msk.f32.mxu1 %vm61_vm0, %v49_v30 }
  0x21   :  { %670 = vmatmul.mubr.msk.f32.gmra.mrb[14].mxu0 %vm61_vm0, %v32_v31  ;;  %697 = vmatmul.mubr.msk.f32.gmra.mrb[14].mxu1 %vm61_vm0, %v50_v32 }
  0x22   :  { %672 = vmatprep.mubr.msk.f32.mxu0 %vm61_vm0, %v33_v33  ;;  %699 = vmatprep.mubr.msk.f32.mxu1 %vm61_vm0, %v51_v34 }
  0x25   :  { %673 = vmatmul.mubr.msk.f32.gmra.mrb[16].mxu0 %vm61_vm0, %v34_v35  ;;  %700 = vmatmul.mubr.msk.f32.gmra.mrb[16].mxu1 %vm61_vm0, %v52_v36 }
  0xd8   :  { %v650_v38 = vpop.f32.mrb[0].mxu0  ;;  %v677_v40 = vpop.f32.mrb[0].mxu1 }
  0xd9   :  { %v242_v41 = vadd.f32 %v650_v38, %v879_v37  ;;  %v332_v42 = vadd.f32 %v677_v40, %v879_v37  ;;  %v236_v43 = vpop.f32.mrb[1].mxu0  ;;  %v326_v44 = vpop.f32.mrb[1].mxu1 }
  0xda   :  { %v237_v45 = vadd.f32 %v879_v37, %v236_v43  ;;  %v327_v46 = vadd.f32 %v879_v37, %v326_v44 }
  0xdb   :  { %vm416_vm2 = vcmp.ge.f32.partialorder %v242_v41, 0.0  ;;  %v459_v47 = vmul.f32 %v884_v39, %v242_v41  ;;  %vm434_vm3 = vcmp.ge.f32.partialorder %v332_v42, 0.0  ;;  %v477_v48 = vmul.f32 %v884_v39, %v332_v42 }
  0xdc   :  { %vm415_vm4 = vcmp.ge.f32.partialorder %v237_v45, 0.0  ;;  %v458_v49 = vmul.f32 %v884_v39, %v237_v45  ;;  %vm433_vm5 = vcmp.ge.f32.partialorder %v327_v46, 0.0  ;;  %v476_v50 = vmul.f32 %v884_v39, %v327_v46  ;;  %v653_v51 = vpop.f32.mrb[2].mxu0  ;;  %v680_v52 = vpop.f32.mrb[2].mxu1 }
  0xdd   :  { %v495_v53 = vsel %vm416_vm2, %v242_v41, %v459_v47  ;;  %v513_v54 = vsel %vm434_vm3, %v332_v42, %v477_v48  ;;  %v252_v55 = vadd.f32 %v653_v51, %v879_v37  ;;  %v342_v56 = vadd.f32 %v680_v52, %v879_v37  ;;  %v246_v57 = vpop.f32.mrb[3].mxu0  ;;  %v336_v58 = vpop.f32.mrb[3].mxu1 }
  0xde   :  { %532 = vst.msk [vmem:[%s1106_s4 + $0x8] sm:$0xff] %vm530_vm1, %v495_v53  ;;  %550 = vst.msk [vmem:[%s1106_s4 + $0x98] sm:$0xff] %vm530_vm1, %v513_v54  ;;  %v494_v59 = vsel %vm415_vm4, %v237_v45, %v458_v49  ;;  %v512_v60 = vsel %vm433_vm5, %v327_v46, %v476_v50  ;;  %v247_v61 = vadd.f32 %v879_v37, %v246_v57 }
  0xdf   :  { %v337_v62 = vadd.f32 %v879_v37, %v336_v58  ;;  %531 = vst.msk [vmem:[%s1106_s4] sm:$0xff] %vm530_vm1, %v494_v59  ;;  %549 = vst.msk [vmem:[%s1106_s4 + $0x90] sm:$0xff] %vm530_vm1, %v512_v60  ;;  %vm418_vm6 = vcmp.ge.f32.partialorder %v252_v55, 0.0  ;;  %v461_v63 = vmul.f32 %v884_v39, %v252_v55  ;;  %vm436_vm7 = vcmp.ge.f32.partialorder %v342_v56, 0.0 }
  0xe0   :  { %v479_v0 = vmul.f32 %v884_v39, %v342_v56  ;;  %vm417_vm8 = vcmp.ge.f32.partialorder %v247_v61, 0.0  ;;  %v460_v1 = vmul.f32 %v884_v39, %v247_v61  ;;  %v656_v3 = vpop.f32.mrb[4].mxu0  ;;  %v683_v4 = vpop.f32.mrb[4].mxu1 }
  0xe1   :  { %vm435_vm9 = vcmp.ge.f32.partialorder %v337_v62, 0.0  ;;  %v478_v2 = vmul.f32 %v884_v39, %v337_v62  ;;  %v497_v5 = vsel %vm418_vm6, %v252_v55, %v461_v63  ;;  %v262_v7 = vadd.f32 %v656_v3, %v879_v37  ;;  %v256_v9 = vpop.f32.mrb[5].mxu0  ;;  %v346_v10 = vpop.f32.mrb[5].mxu1 }
  0xe2   :  { %v515_v6 = vsel %vm436_vm7, %v342_v56, %v479_v0  ;;  %v352_v8 = vadd.f32 %v683_v4, %v879_v37  ;;  %534 = vst.msk [vmem:[%s1106_s4 + $0x18] sm:$0xff] %vm530_vm1, %v497_v5  ;;  %v496_v11 = vsel %vm417_vm8, %v247_v61, %v460_v1  ;;  %v257_v13 = vadd.f32 %v879_v37, %v256_v9 }
  0xe3   :  { %552 = vst.msk [vmem:[%s1106_s4 + $0xa8] sm:$0xff] %vm530_vm1, %v515_v6  ;;  %v514_v12 = vsel %vm435_vm9, %v337_v62, %v478_v2  ;;  %v347_v14 = vadd.f32 %v879_v37, %v346_v10  ;;  %533 = vst.msk [vmem:[%s1106_s4 + $0x10] sm:$0xff] %vm530_vm1, %v496_v11  ;;  %vm420_vm10 = vcmp.ge.f32.partialorder %v262_v7, 0.0  ;;  %v463_v15 = vmul.f32 %v884_v39, %v262_v7 }
  0xe4   :  { %551 = vst.msk [vmem:[%s1106_s4 + $0xa0] sm:$0xff] %vm530_vm1, %v514_v12  ;;  %vm438_vm11 = vcmp.ge.f32.partialorder %v352_v8, 0.0  ;;  %v481_v16 = vmul.f32 %v884_v39, %v352_v8  ;;  %vm419_vm12 = vcmp.ge.f32.partialorder %v257_v13, 0.0  ;;  %v462_v17 = vmul.f32 %v884_v39, %v257_v13  ;;  %v659_v19 = vpop.f32.mrb[6].mxu0  ;;  %v686_v20 = vpop.f32.mrb[6].mxu1 }
  0xe5   :  { %vm437_vm13 = vcmp.ge.f32.partialorder %v347_v14, 0.0  ;;  %v480_v18 = vmul.f32 %v884_v39, %v347_v14  ;;  %v499_v21 = vsel %vm420_vm10, %v262_v7, %v463_v15  ;;  %v272_v23 = vadd.f32 %v659_v19, %v879_v37  ;;  %v266_v25 = vpop.f32.mrb[7].mxu0  ;;  %v356_v26 = vpop.f32.mrb[7].mxu1 }
  0xe6   :  { %v517_v22 = vsel %vm438_vm11, %v352_v8, %v481_v16  ;;  %v362_v24 = vadd.f32 %v686_v20, %v879_v37  ;;  %536 = vst.msk [vmem:[%s1106_s4 + $0x28] sm:$0xff] %vm530_vm1, %v499_v21  ;;  %v498_v27 = vsel %vm419_vm12, %v257_v13, %v462_v17  ;;  %v267_v29 = vadd.f32 %v879_v37, %v266_v25 }
  0xe7   :  { %554 = vst.msk [vmem:[%s1106_s4 + $0xb8] sm:$0xff] %vm530_vm1, %v517_v22  ;;  %v516_v28 = vsel %vm437_vm13, %v347_v14, %v480_v18  ;;  %v357_v30 = vadd.f32 %v879_v37, %v356_v26  ;;  %535 = vst.msk [vmem:[%s1106_s4 + $0x20] sm:$0xff] %vm530_vm1, %v498_v27  ;;  %vm422_vm14 = vcmp.ge.f32.partialorder %v272_v23, 0.0  ;;  %v465_v31 = vmul.f32 %v884_v39, %v272_v23 }
  0xe8   :  { %553 = vst.msk [vmem:[%s1106_s4 + $0xb0] sm:$0xff] %vm530_vm1, %v516_v28  ;;  %vm440_vm15 = vcmp.ge.f32.partialorder %v362_v24, 0.0  ;;  %v483_v32 = vmul.f32 %v884_v39, %v362_v24  ;;  %vm421_vm0 = vcmp.ge.f32.partialorder %v267_v29, 0.0  ;;  %v464_v33 = vmul.f32 %v884_v39, %v267_v29  ;;  %v662_v35 = vpop.f32.mrb[8].mxu0  ;;  %v689_v36 = vpop.f32.mrb[8].mxu1 }
  0xe9   :  { %vm439_vm2 = vcmp.ge.f32.partialorder %v357_v30, 0.0  ;;  %v482_v34 = vmul.f32 %v884_v39, %v357_v30  ;;  %v501_v38 = vsel %vm422_vm14, %v272_v23, %v465_v31  ;;  %v282_v41 = vadd.f32 %v662_v35, %v879_v37  ;;  %v276_v43 = vpop.f32.mrb[9].mxu0  ;;  %v366_v44 = vpop.f32.mrb[9].mxu1 }
  0xea   :  { %v519_v40 = vsel %vm440_vm15, %v362_v24, %v483_v32  ;;  %v372_v42 = vadd.f32 %v689_v36, %v879_v37  ;;  %538 = vst.msk [vmem:[%s1106_s4 + $0x38] sm:$0xff] %vm530_vm1, %v501_v38  ;;  %v500_v45 = vsel %vm421_vm0, %v267_v29, %v464_v33  ;;  %v277_v47 = vadd.f32 %v879_v37, %v276_v43 }
  0xeb   :  { %556 = vst.msk [vmem:[%s1106_s4 + $0xc8] sm:$0xff] %vm530_vm1, %v519_v40  ;;  %v518_v46 = vsel %vm439_vm2, %v357_v30, %v482_v34  ;;  %v367_v48 = vadd.f32 %v879_v37, %v366_v44  ;;  %537 = vst.msk [vmem:[%s1106_s4 + $0x30] sm:$0xff] %vm530_vm1, %v500_v45  ;;  %vm424_vm3 = vcmp.ge.f32.partialorder %v282_v41, 0.0  ;;  %v467_v49 = vmul.f32 %v884_v39, %v282_v41 }
  0xec   :  { %555 = vst.msk [vmem:[%s1106_s4 + $0xc0] sm:$0xff] %vm530_vm1, %v518_v46  ;;  %vm442_vm4 = vcmp.ge.f32.partialorder %v372_v42, 0.0  ;;  %v485_v50 = vmul.f32 %v884_v39, %v372_v42  ;;  %vm423_vm5 = vcmp.ge.f32.partialorder %v277_v47, 0.0  ;;  %v466_v51 = vmul.f32 %v884_v39, %v277_v47  ;;  %v665_v53 = vpop.f32.mrb[10].mxu0  ;;  %v692_v54 = vpop.f32.mrb[10].mxu1 }
  0xed   :  { %vm441_vm6 = vcmp.ge.f32.partialorder %v367_v48, 0.0  ;;  %v484_v52 = vmul.f32 %v884_v39, %v367_v48  ;;  %v503_v55 = vsel %vm424_vm3, %v282_v41, %v467_v49  ;;  %v292_v57 = vadd.f32 %v665_v53, %v879_v37  ;;  %v286_v59 = vpop.f32.mrb[11].mxu0  ;;  %v376_v60 = vpop.f32.mrb[11].mxu1 }
  0xee   :  { %v521_v56 = vsel %vm442_vm4, %v372_v42, %v485_v50  ;;  %v382_v58 = vadd.f32 %v692_v54, %v879_v37  ;;  %540 = vst.msk [vmem:[%s1106_s4 + $0x48] sm:$0xff] %vm530_vm1, %v503_v55  ;;  %v502_v61 = vsel %vm423_vm5, %v277_v47, %v466_v51  ;;  %v287_v63 = vadd.f32 %v879_v37, %v286_v59 }
  0xef   :  { %558 = vst.msk [vmem:[%s1106_s4 + $0xd8] sm:$0xff] %vm530_vm1, %v521_v56  ;;  %v520_v62 = vsel %vm441_vm6, %v367_v48, %v484_v52  ;;  %v377_v0 = vadd.f32 %v879_v37, %v376_v60  ;;  %539 = vst.msk [vmem:[%s1106_s4 + $0x40] sm:$0xff] %vm530_vm1, %v502_v61  ;;  %vm426_vm7 = vcmp.ge.f32.partialorder %v292_v57, 0.0  ;;  %v469_v1 = vmul.f32 %v884_v39, %v292_v57 }
  0xf0   :  { %557 = vst.msk [vmem:[%s1106_s4 + $0xd0] sm:$0xff] %vm530_vm1, %v520_v62  ;;  %vm444_vm8 = vcmp.ge.f32.partialorder %v382_v58, 0.0  ;;  %v487_v2 = vmul.f32 %v884_v39, %v382_v58  ;;  %vm425_vm9 = vcmp.ge.f32.partialorder %v287_v63, 0.0  ;;  %v468_v3 = vmul.f32 %v884_v39, %v287_v63  ;;  %v668_v5 = vpop.f32.mrb[12].mxu0  ;;  %v695_v6 = vpop.f32.mrb[12].mxu1 }
  0xf1   :  { %vm443_vm10 = vcmp.ge.f32.partialorder %v377_v0, 0.0  ;;  %v486_v4 = vmul.f32 %v884_v39, %v377_v0  ;;  %v505_v7 = vsel %vm426_vm7, %v292_v57, %v469_v1  ;;  %v302_v9 = vadd.f32 %v668_v5, %v879_v37  ;;  %v296_v11 = vpop.f32.mrb[13].mxu0  ;;  %v386_v12 = vpop.f32.mrb[13].mxu1 }
  0xf2   :  { %v523_v8 = vsel %vm444_vm8, %v382_v58, %v487_v2  ;;  %v392_v10 = vadd.f32 %v695_v6, %v879_v37  ;;  %542 = vst.msk [vmem:[%s1106_s4 + $0x58] sm:$0xff] %vm530_vm1, %v505_v7  ;;  %v504_v13 = vsel %vm425_vm9, %v287_v63, %v468_v3  ;;  %v297_v15 = vadd.f32 %v879_v37, %v296_v11 }
  0xf3   :  { %560 = vst.msk [vmem:[%s1106_s4 + $0xe8] sm:$0xff] %vm530_vm1, %v523_v8  ;;  %v522_v14 = vsel %vm443_vm10, %v377_v0, %v486_v4  ;;  %v387_v16 = vadd.f32 %v879_v37, %v386_v12  ;;  %541 = vst.msk [vmem:[%s1106_s4 + $0x50] sm:$0xff] %vm530_vm1, %v504_v13  ;;  %vm428_vm11 = vcmp.ge.f32.partialorder %v302_v9, 0.0  ;;  %v471_v17 = vmul.f32 %v884_v39, %v302_v9 }
  0xf4   :  { %559 = vst.msk [vmem:[%s1106_s4 + $0xe0] sm:$0xff] %vm530_vm1, %v522_v14  ;;  %vm446_vm12 = vcmp.ge.f32.partialorder %v392_v10, 0.0  ;;  %v489_v18 = vmul.f32 %v884_v39, %v392_v10  ;;  %vm427_vm13 = vcmp.ge.f32.partialorder %v297_v15, 0.0  ;;  %v470_v19 = vmul.f32 %v884_v39, %v297_v15  ;;  %v671_v21 = vpop.f32.mrb[14].mxu0  ;;  %v698_v22 = vpop.f32.mrb[14].mxu1 }
  0xf5   :  { %vm445_vm14 = vcmp.ge.f32.partialorder %v387_v16, 0.0  ;;  %v488_v20 = vmul.f32 %v884_v39, %v387_v16  ;;  %v507_v23 = vsel %vm428_vm11, %v302_v9, %v471_v17  ;;  %v312_v25 = vadd.f32 %v671_v21, %v879_v37  ;;  %v306_v27 = vpop.f32.mrb[15].mxu0  ;;  %v396_v28 = vpop.f32.mrb[15].mxu1 }
  0xf6   :  { %v525_v24 = vsel %vm446_vm12, %v392_v10, %v489_v18  ;;  %v402_v26 = vadd.f32 %v698_v22, %v879_v37  ;;  %544 = vst.msk [vmem:[%s1106_s4 + $0x68] sm:$0xff] %vm530_vm1, %v507_v23  ;;  %v506_v29 = vsel %vm427_vm13, %v297_v15, %v470_v19  ;;  %v307_v31 = vadd.f32 %v879_v37, %v306_v27 }
  0xf7   :  { %562 = vst.msk [vmem:[%s1106_s4 + $0xf8] sm:$0xff] %vm530_vm1, %v525_v24  ;;  %v524_v30 = vsel %vm445_vm14, %v387_v16, %v488_v20  ;;  %v397_v32 = vadd.f32 %v879_v37, %v396_v28  ;;  %543 = vst.msk [vmem:[%s1106_s4 + $0x60] sm:$0xff] %vm530_vm1, %v506_v29  ;;  %vm430_vm15 = vcmp.ge.f32.partialorder %v312_v25, 0.0  ;;  %v473_v33 = vmul.f32 %v884_v39, %v312_v25 }
  0xf8   :  { %561 = vst.msk [vmem:[%s1106_s4 + $0xf0] sm:$0xff] %vm530_vm1, %v524_v30  ;;  %vm448_vm0 = vcmp.ge.f32.partialorder %v402_v26, 0.0  ;;  %v491_v34 = vmul.f32 %v884_v39, %v402_v26  ;;  %vm429_vm2 = vcmp.ge.f32.partialorder %v307_v31, 0.0  ;;  %v472_v35 = vmul.f32 %v884_v39, %v307_v31  ;;  %v674_v38 = vpop.f32.mrb[16].mxu0  ;;  %v701_v40 = vpop.f32.mrb[16].mxu1 }
  0xf9   :  { %vm447_vm3 = vcmp.ge.f32.partialorder %v397_v32, 0.0  ;;  %v490_v36 = vmul.f32 %v884_v39, %v397_v32  ;;  %v509_v41 = vsel %vm430_vm15, %v312_v25, %v473_v33  ;;  %v322_v43 = vadd.f32 %v674_v38, %v879_v37  ;;  %v316_v45 = vpop.f32.mrb[17].mxu0  ;;  %v406_v46 = vpop.f32.mrb[17].mxu1 }
  0xfa   :  { %v527_v42 = vsel %vm448_vm0, %v402_v26, %v491_v34  ;;  %v412_v44 = vadd.f32 %v701_v40, %v879_v37  ;;  %546 = vst.msk [vmem:[%s1106_s4 + $0x78] sm:$0xff] %vm530_vm1, %v509_v41  ;;  %v508_v47 = vsel %vm429_vm2, %v307_v31, %v472_v35  ;;  %v317_v49 = vadd.f32 %v879_v37, %v316_v45 }
  0xfb   :  { %564 = vst.msk [vmem:[%s1106_s4 + $0x108] sm:$0xff] %vm530_vm1, %v527_v42  ;;  %v526_v48 = vsel %vm447_vm3, %v397_v32, %v490_v36  ;;  %v407_v50 = vadd.f32 %v879_v37, %v406_v46  ;;  %545 = vst.msk [vmem:[%s1106_s4 + $0x70] sm:$0xff] %vm530_vm1, %v508_v47  ;;  %vm432_vm4 = vcmp.ge.f32.partialorder %v322_v43, 0.0  ;;  %v475_v51 = vmul.f32 %v884_v39, %v322_v43 }
  0xfc   :  { %563 = vst.msk [vmem:[%s1106_s4 + $0x100] sm:$0xff] %vm530_vm1, %v526_v48  ;;  %vm450_vm5 = vcmp.ge.f32.partialorder %v412_v44, 0.0  ;;  %v493_v52 = vmul.f32 %v884_v39, %v412_v44  ;;  %vm431_vm6 = vcmp.ge.f32.partialorder %v317_v49, 0.0  ;;  %v474_v53 = vmul.f32 %v884_v39, %v317_v49 }
  0xfd   :  { %vm449_vm7 = vcmp.ge.f32.partialorder %v407_v50, 0.0  ;;  %v492_v37 = vmul.f32 %v884_v39, %v407_v50  ;;  %v511_v54 = vsel %vm432_vm4, %v322_v43, %v475_v51 }
  0xfe   :  { %v529_v55 = vsel %vm450_vm5, %v412_v44, %v493_v52  ;;  %548 = vst.msk [vmem:[%s1106_s4 + $0x88] sm:$0xff] %vm530_vm1, %v511_v54  ;;  %v510_v56 = vsel %vm431_vm6, %v317_v49, %v474_v53 }
  0xff   :  { %566 = vst.msk [vmem:[%s1106_s4 + $0x118] sm:$0xff] %vm530_vm1, %v529_v55  ;;  %v528_v57 = vsel %vm449_vm7, %v407_v50, %v492_v37  ;;  %547 = vst.msk [vmem:[%s1106_s4 + $0x80] sm:$0xff] %vm530_vm1, %v510_v56 }
 0x100   :  { %565 = vst.msk [vmem:[%s1106_s4 + $0x110] sm:$0xff] %vm530_vm1, %v528_v57 }

// kernel: cross_scale_attention_forward.5
= control target key start
LH: loop header
LB: loop body
LE: loop exit
PB: predicated region body
PF: predicated region fallthrough
CT: control target
= control target key end

     0   :  { %s1725_s12 = smov 0   ;;  %s1727_s13 = smov 0   ;;  %s2180_s0 = inlined_call_operand.vmem [shape: bf16[2,144,36], index: 0, kind: input, shape index: {}]   ;;  %s2181_s1 = inlined_call_operand.vmem [shape: bf16[2,36,16], index: 1, kind: input, shape index: {}]   ;;  %s2182_s2 = inlined_call_operand.vmem [shape: bf16[2,16,768], index: 2, kind: input, shape index: {}]   ;;  %s2183_s3 = inlined_call_operand.vmem [shape: f32[2,144,768], index: 3, kind: output, shape index: {}]  }
   0x1   :  { %s1729_s14 = smov 0  }
   0x2 LB: > { %s32_s15 = sadd.s32 1, %s1696_s13  ;;  %p1439_p0 = scmp.ge.s32.totalorder %s1700_s14, 1  ;;  %s1700_s14 = sphi %s1729_s14, %s13_s14   ;;  %s1696_s13 = sphi %s1727_s13, %s2185_s13   ;;  %s1692_s12 = sphi %s1725_s12, %s2184_s12  }
   0x3   : > { %p34_p1 = scmp.ge.s32.totalorder %s32_s15, 2  ;;  %p194_p2 = scmp.lt.s32.totalorder %s1700_s14, 3 }
   0x5   : > { %s2187_s15 = smov (%p34_p1, %s32_s15), 0  ;;  %p195_p3 = pnand %p1439_p0, %p194_p2 }
   0x6   : > { %p246_p4 = scmp.lt.s32.totalorder (!%p195_p3), %s1692_s12, 1  ;;  %v1702_v0 = vmov (!%p195_p3), 0.0   ;;  %vm1703_vm0 = vmmov (!%p195_p3), 0   ;;  %vm402_vm1 = vcmask (!%p195_p3), 1041408   ;;  %vm374_vm2 = vcmask (!%p195_p3), 293888  }
   0x7   : > { %198 = sbr.rel (%p195_p3) target bundleno = 925 (0x39d), region = 32  ;;  %1512 = vmatprep.subr.bf16.mxu0 (!%p195_p3), %v1702_v0  ;;  %1518 = vmatprep.mubr.msk.bf16.mxu0 (!%p195_p3), %vm1703_vm0, %v1702_v0  ;;  %vm511_vm3 = vcmask (!%p195_p3), 130048  }
   0xe   : > { %s2189_s12 = smov (!%p246_p4, %s1692_s12), 1 }
   0xf   : > { %s1554_s16 = smul.u32 72, %s2189_s12 }
  0x10   : > { %s1555_s17 = smul.u32 20, %s2189_s12 }
  0x11   : > { %s1751_s20 = scalar_lea.vmem %s2180_s0, %s1554_s16  ;;  %s1556_s24 = smul.u32 48, %s2189_s12 }
  0x12   : > { %s259_s23 = scalar_lea.vmem %s2181_s1, %s1555_s17  ;;  %v1588_v5 = vld [vmem:[%s1751_s20] sm:$0xff]   ;;  %v1589_v6 = vld [vmem:[%s1751_s20 + $0x8] sm:$0xff]   ;;  %v1590_v7 = vld [vmem:[%s1751_s20 + $0x10] sm:$0xff]   ;;  %s1557_s28 = smul.u32 864, %s2189_s12 }
  0x13   : > { %v1585_v1 = vld [vmem:[%s259_s23] sm:$0xff]   ;;  %v1586_v2 = vld [vmem:[%s259_s23 + $0x8] sm:$0xff]   ;;  %v1587_v3 = vld [vmem:[%s259_s23 + $0x10] ss:$0 sps:$4 sm:$0x33]   ;;  %s1912_s27 = scalar_lea.vmem %s2182_s2, %s1556_s24 }
  0x14   : > { %1513 = vmatpush3.bf16.msra.mxu0 %v1585_v1  ;;  %v404_v4 = vsel %vm402_vm1, %v1587_v3, 0  ;;  %v1591_v8 = vld [vmem:[%s1751_s20 + $0x18] sm:$0xff]   ;;  %v1592_v9 = vld [vmem:[%s1751_s20 + $0x20] sm:$0xff]   ;;  %v1593_v10 = vld [vmem:[%s1751_s20 + $0x28] sm:$0xff]   ;;  %s2061_s4 = scalar_lea.vmem %s2183_s3, %s1557_s28 }
  0x15   : > { %1514 = vmatprep.subr.bf16.mxu0 %v1702_v0  ;;  %v1594_v11 = vld [vmem:[%s1751_s20 + $0x30] sm:$0xff]   ;;  %v1595_v12 = vld [vmem:[%s1751_s20 + $0x38] sm:$0xff]   ;;  %v1596_v13 = vld [vmem:[%s1751_s20 + $0x40] sm:$0xff]  }
  0x18   : > { %1515 = vmatpush3.bf16.msra.mxu0 %v1586_v2 }
  0x19   : > { %1516 = vmatprep.subr.bf16.mxu0 %v1702_v0 }
  0x1c   : > { %1517 = vmatpush3.bf16.msra.mxu0 %v404_v4 }
  0x1f   : > { %1519 = vmatmul.mubr.msk.bf16.vlgmr.msra.gmra.mrb[0].mxu0 %vm374_vm2, %v1588_v5 }
  0x20   : > { %1522 = vmatprep.mubr.msk.bf16.mxu0 %vm1703_vm0, %v1702_v0 }
  0x27   : > { %1523 = vmatmul.mubr.msk.bf16.gmra.mrb[4].mxu0 %vm374_vm2, %v1589_v6 }
  0x28   : > { %1526 = vmatprep.mubr.msk.bf16.mxu0 %vm1703_vm0, %v1702_v0 }
  0x2f   : > { %1527 = vmatmul.mubr.msk.bf16.gmra.mrb[8].mxu0 %vm374_vm2, %v1590_v7 }
  0x30   : > { %1530 = vmatprep.mubr.msk.bf16.mxu0 %vm1703_vm0, %v1702_v0 }
  0x37   : > { %1531 = vmatmul.mubr.msk.bf16.gmra.mrb[12].mxu0 %vm374_vm2, %v1591_v8 }
  0x38   : > { %1534 = vmatprep.mubr.msk.bf16.mxu0 %vm1703_vm0, %v1702_v0 }
  0x3f   : > { %1535 = vmatmul.mubr.msk.bf16.gmra.mrb[16].mxu0 %vm374_vm2, %v1592_v9 }
  0x40   : > { %1538 = vmatprep.mubr.msk.bf16.mxu0 %vm1703_vm0, %v1702_v0 }
  0x47   : > { %1539 = vmatmul.mubr.msk.bf16.gmra.mrb[20].mxu0 %vm374_vm2, %v1593_v10 }
  0x48   : > { %1542 = vmatprep.mubr.msk.bf16.mxu0 %vm1703_vm0, %v1702_v0 }
  0x4f   : > { %1543 = vmatmul.mubr.msk.bf16.gmra.mrb[24].mxu0 %vm374_vm2, %v1594_v11 }
  0x50   : > { %1546 = vmatprep.mubr.msk.bf16.mxu0 %vm1703_vm0, %v1702_v0 }
  0x57   : > { %1547 = vmatmul.mubr.msk.bf16.gmra.mrb[28].mxu0 %vm374_vm2, %v1595_v12 }
  0x58   : > { %1550 = vmatprep.mubr.msk.bf16.mxu0 %vm1703_vm0, %v1702_v0 }
  0x5f   : > { %1551 = vmatmul.mubr.msk.bf16.gmra.mrb[32].mxu0 %vm374_vm2, %v1596_v13 }
  0xf2   : > { %v1782_v14 = vpop.f32.mrb[0].mxu0 }
  0xf3   : > { %v1520_v15 = vpop.f32.mrb[1].mxu0  ;;  %v512_v16 = vsel %vm511_vm3, %v1782_v14, -inf }
  0xf4   : > { %513 = vmax.xlane.f32.xlu0 %v512_v16  ;;  %v1786_v17 = vpop.f32.mrb[2].mxu0 }
  0xf5   : > { %v1521_v18 = vpop.f32.mrb[3].mxu0  ;;  %v515_v19 = vsel %vm511_vm3, %v1786_v17, -inf }
  0xf8   : > { %516 = vmax.xlane.f32.xlu0 %v515_v19 }
  0xfa   : > { %v1790_v20 = vpop.f32.mrb[4].mxu0 }
  0xfb   : > { %v1524_v21 = vpop.f32.mrb[5].mxu0  ;;  %v518_v22 = vsel %vm511_vm3, %v1790_v20, -inf }
  0xfc   : > { %519 = vmax.xlane.f32.xlu1 %v518_v22  ;;  %v1794_v23 = vpop.f32.mrb[6].mxu0 }
  0xfd   : > { %v1525_v24 = vpop.f32.mrb[7].mxu0  ;;  %v521_v25 = vsel %vm511_vm3, %v1794_v23, -inf }
 0x100   : > { %522 = vmax.xlane.f32.xlu1 %v521_v25 }
 0x102   : > { %v1798_v26 = vpop.f32.mrb[8].mxu0 }
 0x103   : > { %v1528_v27 = vpop.f32.mrb[9].mxu0  ;;  %v524_v28 = vsel %vm511_vm3, %v1798_v26, -inf }
 0x104   : > { %525 = vmax.xlane.f32.xlu0 %v524_v28  ;;  %v1802_v29 = vpop.f32.mrb[10].mxu0 }
 0x105   : > { %v1529_v30 = vpop.f32.mrb[11].mxu0  ;;  %v527_v31 = vsel %vm511_vm3, %v1802_v29, -inf }
 0x106   : > { %528 = vmax.xlane.f32.xlu1 %v527_v31 }
 0x10a   : > { %v1806_v32 = vpop.f32.mrb[12].mxu0 }
 0x10b   : > { %v1532_v33 = vpop.f32.mrb[13].mxu0  ;;  %v530_v34 = vsel %vm511_vm3, %v1806_v32, -inf }
 0x10c   : > { %531 = vmax.xlane.f32.xlu0 %v530_v34  ;;  %v1810_v35 = vpop.f32.mrb[14].mxu0 }
 0x10d   : > { %v1533_v36 = vpop.f32.mrb[15].mxu0  ;;  %v533_v37 = vsel %vm511_vm3, %v1810_v35, -inf }
 0x10e   : > { %534 = vmax.xlane.f32.xlu1 %v533_v37 }
 0x112   : > { %v1814_v38 = vpop.f32.mrb[16].mxu0 }
 0x113   : > { %v1536_v39 = vpop.f32.mrb[17].mxu0  ;;  %v536_v40 = vsel %vm511_vm3, %v1814_v38, -inf }
 0x114   : > { %537 = vmax.xlane.f32.xlu0 %v536_v40  ;;  %v1818_v41 = vpop.f32.mrb[18].mxu0 }
 0x115   : > { %v1537_v42 = vpop.f32.mrb[19].mxu0  ;;  %v539_v43 = vsel %vm511_vm3, %v1818_v41, -inf }
 0x116   : > { %540 = vmax.xlane.f32.xlu1 %v539_v43 }
 0x11a   : > { %v1822_v44 = vpop.f32.mrb[20].mxu0 }
 0x11b   : > { %v1540_v45 = vpop.f32.mrb[21].mxu0  ;;  %v542_v46 = vsel %vm511_vm3, %v1822_v44, -inf }
 0x11c   : > { %543 = vmax.xlane.f32.xlu0 %v542_v46  ;;  %v1826_v47 = vpop.f32.mrb[22].mxu0 }
 0x11d   : > { %v1541_v48 = vpop.f32.mrb[23].mxu0  ;;  %v545_v49 = vsel %vm511_vm3, %v1826_v47, -inf }
 0x11e   : > { %546 = vmax.xlane.f32.xlu1 %v545_v49 }
 0x122   : > { %v1830_v50 = vpop.f32.mrb[24].mxu0 }
 0x123   : > { %v1544_v51 = vpop.f32.mrb[25].mxu0  ;;  %v548_v52 = vsel %vm511_vm3, %v1830_v50, -inf }
 0x124   : > { %549 = vmax.xlane.f32.xlu0 %v548_v52  ;;  %v1834_v53 = vpop.f32.mrb[26].mxu0 }
 0x125   : > { %v1545_v54 = vpop.f32.mrb[27].mxu0  ;;  %v551_v55 = vsel %vm511_vm3, %v1834_v53, -inf }
 0x126   : > { %552 = vmax.xlane.f32.xlu1 %v551_v55 }
 0x12a   : > { %v1838_v56 = vpop.f32.mrb[28].mxu0 }
 0x12b   : > { %v1548_v57 = vpop.f32.mrb[29].mxu0  ;;  %v554_v58 = vsel %vm511_vm3, %v1838_v56, -inf }
 0x12c   : > { %555 = vmax.xlane.f32.xlu0 %v554_v58  ;;  %v1842_v59 = vpop.f32.mrb[30].mxu0 }
 0x12d   : > { %v1549_v60 = vpop.f32.mrb[31].mxu0  ;;  %v557_v61 = vsel %vm511_vm3, %v1842_v59, -inf }
 0x12e   : > { %558 = vmax.xlane.f32.xlu1 %v557_v61 }
 0x132   : > { %v1846_v62 = vpop.f32.mrb[32].mxu0 }
 0x133   : > { %v1552_v63 = vpop.f32.mrb[33].mxu0  ;;  %v560_v0 = vsel %vm511_vm3, %v1846_v62, -inf }
 0x134   : > { %561 = vmax.xlane.f32.xlu0 %v560_v0  ;;  %v1850_v1 = vpop.f32.mrb[34].mxu0 }
 0x135   : > { %v1553_v2 = vpop.f32.mrb[35].mxu0  ;;  %v563_v3 = vsel %vm511_vm3, %v1850_v1, -inf }
 0x136   : > { %564 = vmax.xlane.f32.xlu1 %v563_v3 }
 0x181   : > { %v514_v4 = vpop.xlane.xlu0 %513 }
 0x182   : > { %v566_v5 = vsub.f32 %v1782_v14, %v514_v4 }
 0x184   : > { %v584_v6 = vmul.f32 1.442695, %v566_v5 }
 0x185   : > { %v517_v7 = vpop.xlane.xlu0 %516 }
 0x186   : > { %1606 = vpow2.f32 %v584_v6  ;;  %v567_v8 = vsub.f32 %v1786_v17, %v517_v7 }
 0x188   : > { %v586_v9 = vmul.f32 1.442695, %v567_v8 }
 0x189   : > { %v520_v10 = vpop.xlane.xlu1 %519 }
 0x18a   : > { %1608 = vpow2.f32 %v586_v9  ;;  %v568_v11 = vsub.f32 %v1790_v20, %v520_v10  ;;  %v1599_v9 = vld [vmem:[%s1912_s27] ss:$24 sps:$4 sm:$0xff]  }
 0x18c   : > { %v588_v12 = vmul.f32 1.442695, %v568_v11  ;;  %v1600_v11 = vld [vmem:[%s1912_s27 + $0x10] ss:$24 sps:$4 sm:$0xff]  }
 0x18d   : > { %v523_v13 = vpop.xlane.xlu1 %522 }
 0x18e   : > { %1610 = vpow2.f32 %v588_v12  ;;  %v569_v15 = vsub.f32 %v1794_v23, %v523_v13  ;;  %v1602_v12 = vld [vmem:[%s1912_s27 + $0x14] ss:$24 sps:$4 sm:$0xff]  }
 0x18f   : > { %1065 = vmatprep.subr.bf16.mxu0 %v1602_v12 }
 0x190   : > { %v1858_v16 = vpop.eup %1606  ;;  %v590_v18 = vmul.f32 1.442695, %v569_v15  ;;  %1066 = vmatpush1.bf16.msra.mxu0 %v1600_v11 }
 0x191   : > { %v526_v19 = vpop.xlane.xlu0 %525  ;;  %v620_v14 = vsel %vm511_vm3, %v1858_v16, 0.0 }
 0x192   : > { %1612 = vpow2.f32 %v590_v18  ;;  %v570_v17 = vsub.f32 %v1798_v26, %v526_v19  ;;  %621 = vadd.xlane.f32.xlu0 %v620_v14 }
 0x193   : > { %v529_v21 = vpop.xlane.xlu1 %528 }
 0x194   : > { %v1863_v22 = vpop.eup %1608  ;;  %v592_v20 = vmul.f32 1.442695, %v570_v17  ;;  %v571_v24 = vsub.f32 %v1802_v29, %v529_v21  ;;  %v1704_v21 = vmov 0  }
 0x195   : > { %v623_v23 = vsel %vm511_vm3, %v1863_v22, 0.0  ;;  %851 = vmatprep.mubr.bf16.mxu1 %v1704_v21  ;;  %1097 = vmatprep.mubr.bf16.mxu0 %v1704_v21 }
 0x196   : > { %1614 = vpow2.f32 %v592_v20  ;;  %v594_v25 = vmul.f32 1.442695, %v571_v24  ;;  %624 = vadd.xlane.f32.xlu1 %v623_v23 }
 0x198   : > { %v1868_v27 = vpop.eup %1610  ;;  %1616 = vpow2.f32 %v594_v25 }
 0x199   : > { %v532_v28 = vpop.xlane.xlu0 %531  ;;  %v626_v26 = vsel %vm511_vm3, %v1868_v27, 0.0 }
 0x19a   : > { %v572_v30 = vsub.f32 %v1806_v32, %v532_v28  ;;  %627 = vadd.xlane.f32.xlu0 %v626_v26 }
 0x19b   : > { %v535_v31 = vpop.xlane.xlu1 %534 }
 0x19c   : > { %v1873_v33 = vpop.eup %1612  ;;  %v596_v29 = vmul.f32 1.442695, %v572_v30  ;;  %v573_v34 = vsub.f32 %v1810_v35, %v535_v31 }
 0x19d   : > { %v629_v36 = vsel %vm511_vm3, %v1873_v33, 0.0 }
 0x19e   : > { %1618 = vpow2.f32 %v596_v29  ;;  %v598_v37 = vmul.f32 1.442695, %v573_v34  ;;  %630 = vadd.xlane.f32.xlu1 %v629_v36 }
 0x1a0   : > { %v1878_v39 = vpop.eup %1614  ;;  %1620 = vpow2.f32 %v598_v37 }
 0x1a1   : > { %v538_v40 = vpop.xlane.xlu0 %537  ;;  %v632_v32 = vsel %vm511_vm3, %v1878_v39, 0.0 }
 0x1a2   : > { %v1882_v42 = vpop.eup %1616  ;;  %v574_v43 = vsub.f32 %v1814_v38, %v538_v40  ;;  %633 = vadd.xlane.f32.xlu0 %v632_v32  ;;  %v1605_v40 = vld [vmem:[%s1912_s27 + $0xc] ss:$24 sps:$4 sm:$0xff]  }
 0x1a3   : > { %v541_v45 = vpop.xlane.xlu1 %540  ;;  %v635_v35 = vsel %vm511_vm3, %v1882_v42, 0.0 }
 0x1a4   : > { %v600_v46 = vmul.f32 1.442695, %v574_v43  ;;  %v575_v48 = vsub.f32 %v1818_v41, %v541_v45  ;;  %636 = vadd.xlane.f32.xlu1 %v635_v35 }
 0x1a6   : > { %1622 = vpow2.f32 %v600_v46  ;;  %v602_v49 = vmul.f32 1.442695, %v575_v48 }
 0x1a8   : > { %v1888_v51 = vpop.eup %1618  ;;  %1624 = vpow2.f32 %v602_v49 }
 0x1a9   : > { %v544_v52 = vpop.xlane.xlu0 %543  ;;  %v638_v54 = vsel %vm511_vm3, %v1888_v51, 0.0 }
 0x1aa   : > { %v1892_v55 = vpop.eup %1620  ;;  %v576_v38 = vsub.f32 %v1822_v44, %v544_v52  ;;  %639 = vadd.xlane.f32.xlu0 %v638_v54 }
 0x1ab   : > { %v547_v57 = vpop.xlane.xlu1 %546  ;;  %v641_v58 = vsel %vm511_vm3, %v1892_v55, 0.0 }
 0x1ac   : > { %v604_v41 = vmul.f32 1.442695, %v576_v38  ;;  %v577_v60 = vsub.f32 %v1826_v47, %v547_v57  ;;  %642 = vadd.xlane.f32.xlu1 %v641_v58 }
 0x1ae   : > { %1626 = vpow2.f32 %v604_v41  ;;  %v606_v61 = vmul.f32 1.442695, %v577_v60 }
 0x1b0   : > { %v1898_v63 = vpop.eup %1622  ;;  %1628 = vpow2.f32 %v606_v61 }
 0x1b1   : > { %v550_v0 = vpop.xlane.xlu0 %549  ;;  %v644_v2 = vsel %vm511_vm3, %v1898_v63, 0.0 }
 0x1b2   : > { %v1902_v44 = vpop.eup %1624  ;;  %v578_v3 = vsub.f32 %v1830_v50, %v550_v0  ;;  %645 = vadd.xlane.f32.xlu0 %v644_v2  ;;  %v1597_v50 = vld [vmem:[%s1912_s27 + $0x4] ss:$24 sps:$4 sm:$0xff]  }
 0x1b3   : > { %v553_v4 = vpop.xlane.xlu1 %552  ;;  %v647_v47 = vsel %vm511_vm3, %v1902_v44, 0.0  ;;  %819 = vmatprep.subr.bf16.mxu1 %v1597_v50 }
 0x1b4   : > { %v608_v5 = vmul.f32 1.442695, %v578_v3  ;;  %v579_v6 = vsub.f32 %v1834_v53, %v553_v4  ;;  %648 = vadd.xlane.f32.xlu1 %v647_v47  ;;  %820 = vmatpush1.bf16.msra.mxu1 %v1599_v9 }
 0x1b5   : > { %942 = vmatprep.subr.bf16.mxu1 %v1605_v40 }
 0x1b6   : > { %1630 = vpow2.f32 %v608_v5  ;;  %v610_v7 = vmul.f32 1.442695, %v579_v6 }
 0x1b8   : > { %v1915_v8 = vpop.eup %1626  ;;  %1632 = vpow2.f32 %v610_v7 }
 0x1b9   : > { %v556_v10 = vpop.xlane.xlu0 %555  ;;  %v650_v53 = vsel %vm511_vm3, %v1915_v8, 0.0 }
 0x1ba   : > { %v1922_v13 = vpop.eup %1628  ;;  %v580_v15 = vsub.f32 %v1838_v56, %v556_v10  ;;  %651 = vadd.xlane.f32.xlu0 %v650_v53 }
 0x1bb   : > { %v559_v18 = vpop.xlane.xlu1 %558  ;;  %v653_v19 = vsel %vm511_vm3, %v1922_v13, 0.0 }
 0x1bc   : > { %v612_v14 = vmul.f32 1.442695, %v580_v15  ;;  %v581_v17 = vsub.f32 %v1842_v59, %v559_v18  ;;  %654 = vadd.xlane.f32.xlu1 %v653_v19 }
 0x1be   : > { %1634 = vpow2.f32 %v612_v14  ;;  %v614_v20 = vmul.f32 1.442695, %v581_v17 }
 0x1c0   : > { %v1930_v56 = vpop.eup %1630  ;;  %1636 = vpow2.f32 %v614_v20 }
 0x1c1   : > { %v562_v24 = vpop.xlane.xlu0 %561  ;;  %v656_v23 = vsel %vm511_vm3, %v1930_v56, 0.0 }
 0x1c2   : > { %v1934_v25 = vpop.eup %1632  ;;  %v582_v59 = vsub.f32 %v1846_v62, %v562_v24  ;;  %657 = vadd.xlane.f32.xlu0 %v656_v23 }
 0x1c3   : > { %v565_v28 = vpop.xlane.xlu1 %564  ;;  %v659_v26 = vsel %vm511_vm3, %v1934_v25, 0.0 }
 0x1c4   : > { %v616_v30 = vmul.f32 1.442695, %v582_v59  ;;  %v583_v31 = vsub.f32 %v1850_v1, %v565_v28  ;;  %660 = vadd.xlane.f32.xlu1 %v659_v26 }
 0x1c6   : > { %1638 = vpow2.f32 %v616_v30  ;;  %v618_v29 = vmul.f32 1.442695, %v583_v31 }
 0x1c8   : > { %v1940_v34 = vpop.eup %1634  ;;  %1640 = vpow2.f32 %v618_v29 }
 0x1c9   : > { %v662_v36 = vsel %vm511_vm3, %v1940_v34, 0.0 }
 0x1ca   : > { %v1944_v37 = vpop.eup %1636  ;;  %663 = vadd.xlane.f32.xlu0 %v662_v36 }
 0x1cb   : > { %v665_v62 = vsel %vm511_vm3, %v1944_v37, 0.0 }
 0x1cc   : > { %666 = vadd.xlane.f32.xlu1 %v665_v62 }
 0x1d0   : > { %v1949_v32 = vpop.eup %1638 }
 0x1d1   : > { %v668_v1 = vsel %vm511_vm3, %v1949_v32, 0.0 }
 0x1d2   : > { %v1953_v43 = vpop.eup %1640  ;;  %669 = vadd.xlane.f32.xlu0 %v668_v1 }
 0x1d3   : > { %v671_v45 = vsel %vm511_vm3, %v1953_v43, 0.0 }
 0x1d4   : > { %672 = vadd.xlane.f32.xlu1 %v671_v45 }
 0x21f   : > { %v622_v35 = vpop.xlane.xlu0 %621 }
 0x220   : > { %v674_v46 = vmul.f32 6.0, %v622_v35 }
 0x222   : > { %1642 = vrcp.f32 %v674_v46 }
 0x223   : > { %v625_v48 = vpop.xlane.xlu1 %624 }
 0x224   : > { %v675_v49 = vmul.f32 6.0, %v625_v48 }
 0x226   : > { %1644 = vrcp.f32 %v675_v49 }
 0x227   : > { %v628_v52 = vpop.xlane.xlu0 %627 }
 0x228   : > { %v676_v54 = vmul.f32 6.0, %v628_v52 }
 0x22a   : > { %1646 = vrcp.f32 %v676_v54 }
 0x22b   : > { %v631_v38 = vpop.xlane.xlu1 %630 }
 0x22c   : > { %v677_v57 = vmul.f32 6.0, %v631_v38  ;;  %v1643_v58 = vpop.eup %1642 }
 0x22d   : > { %v710_v0 = vmul.f32 %v1643_v58, %v1858_v16 }
 0x22e   : > { %1648 = vrcp.f32 %v677_v57 }
 0x22f   : > { %v634_v41 = vpop.xlane.xlu0 %633 }
 0x230   : > { %v1645_v60 = vpop.eup %1644  ;;  %v678_v61 = vmul.f32 6.0, %v634_v41 }
 0x231   : > { %v711_v2 = vmul.f32 %v1645_v60, %v1863_v22  ;;  %v637_v3 = vpop.xlane.xlu1 %636  ;;  %v1603_v22 = vld [vmem:[%s1912_s27 + $0x8] ss:$24 sps:$4 sm:$0xff]  }
 0x232   : > { %1650 = vrcp.f32 %v678_v61  ;;  %v679_v4 = vmul.f32 6.0, %v637_v3 }
 0x233   : > { %v728_v47 = vpack.c.bf16 %v711_v2, %v710_v0 }
 0x234   : > { %1652 = vrcp.f32 %v679_v4  ;;  %v1647_v5 = vpop.eup %1646 }
 0x235   : > { %737 = vst.msk [vmem:[#allocation2] sm:$0xff] %vm511_vm3, %v728_v47  ;;  %v712_v9 = vmul.f32 %v1647_v5, %v1868_v27 }
 0x237   : > { %v640_v6 = vpop.xlane.xlu0 %639 }
 0x238   : > { %v1649_v7 = vpop.eup %1648  ;;  %v680_v50 = vmul.f32 6.0, %v640_v6 }
 0x239   : > { %v713_v10 = vmul.f32 %v1649_v7, %v1873_v33  ;;  %v643_v53 = vpop.xlane.xlu1 %642 }
 0x23a   : > { %1654 = vrcp.f32 %v680_v50  ;;  %v681_v16 = vmul.f32 6.0, %v643_v53 }
 0x23b   : > { %v729_v11 = vpack.c.bf16 %v713_v10, %v712_v9 }
 0x23c   : > { %v1651_v12 = vpop.eup %1650  ;;  %1656 = vrcp.f32 %v681_v16  ;;  %v1963_v15 = vld [vmem:[#allocation2] sm:$0xff] }
 0x23d   : > { %738 = vst.msk [vmem:[#allocation2 + $0x8] sm:$0xff] %vm511_vm3, %v729_v11  ;;  %1471 = vmatmul.mubr.msk.bf16.vlgmr.msra.gmra.mrb[0].mxu1 %vm511_vm3, %v1963_v15  ;;  %1489 = vmatmul.mubr.msk.bf16.vlgmr.msra.gmra.mrb[36].mxu0 %vm511_vm3, %v1963_v15  ;;  %v714_v33 = vmul.f32 %v1651_v12, %v1878_v39 }
 0x23e   : > { %v1653_v27 = vpop.eup %1652  ;;  %943 = vmatpush1.bf16.msra.mxu1 %v1603_v22  ;;  %861 = vmatprep.mubr.bf16.mxu1 %v1704_v21 }
 0x23f   : > { %v715_v18 = vmul.f32 %v1653_v27, %v1882_v42  ;;  %v646_v19 = vpop.xlane.xlu0 %645  ;;  %1107 = vmatprep.mubr.bf16.mxu0 %v1704_v21 }
 0x240   : > { %v682_v14 = vmul.f32 6.0, %v646_v19 }
 0x241   : > { %v730_v17 = vpack.c.bf16 %v715_v18, %v714_v33  ;;  %v649_v20 = vpop.xlane.xlu1 %648 }
 0x242   : > { %1658 = vrcp.f32 %v682_v14  ;;  %v683_v24 = vmul.f32 6.0, %v649_v20 }
 0x243   : > { %739 = vst.msk [vmem:[#allocation2 + $0x10] sm:$0xff] %vm511_vm3, %v730_v17 }
 0x244   : > { %v1655_v23 = vpop.eup %1654  ;;  %1660 = vrcp.f32 %v683_v24  ;;  %v1975_v59 = vld [vmem:[#allocation2 + $0x8] sm:$0xff] }
 0x245   : > { %1472 = vmatmul.mubr.msk.bf16.gmra.mrb[4].mxu1 %vm511_vm3, %v1975_v59  ;;  %1490 = vmatmul.mubr.msk.bf16.gmra.mrb[40].mxu0 %vm511_vm3, %v1975_v59  ;;  %v716_v42 = vmul.f32 %v1655_v23, %v1888_v51 }
 0x246   : > { %v1657_v39 = vpop.eup %1656  ;;  %871 = vmatprep.mubr.bf16.mxu1 %v1704_v21  ;;  %1117 = vmatprep.mubr.bf16.mxu0 %v1704_v21 }
 0x247   : > { %v717_v28 = vmul.f32 %v1657_v39, %v1892_v55  ;;  %v652_v26 = vpop.xlane.xlu0 %651 }
 0x248   : > { %v684_v30 = vmul.f32 6.0, %v652_v26 }
 0x249   : > { %v731_v31 = vpack.c.bf16 %v717_v28, %v716_v42  ;;  %v655_v29 = vpop.xlane.xlu1 %654 }
 0x24a   : > { %1662 = vrcp.f32 %v684_v30  ;;  %v685_v36 = vmul.f32 6.0, %v655_v29  ;;  %v1986_v40 = vld [vmem:[#allocation2 + $0x10] sm:$0xff] }
 0x24b   : > { %740 = vst.msk [vmem:[#allocation2 + $0x18] sm:$0xff] %vm511_vm3, %v731_v31 }
 0x24c   : > { %v1659_v62 = vpop.eup %1658  ;;  %1664 = vrcp.f32 %v685_v36 }
 0x24d   : > { %1473 = vmatmul.mubr.msk.bf16.gmra.mrb[8].mxu1 %vm511_vm3, %v1986_v40  ;;  %1491 = vmatmul.mubr.msk.bf16.gmra.mrb[44].mxu0 %vm511_vm3, %v1986_v40  ;;  %v718_v55 = vmul.f32 %v1659_v62, %v1898_v63 }
 0x24e   : > { %v1661_v51 = vpop.eup %1660  ;;  %881 = vmatprep.mubr.bf16.mxu1 %v1704_v21  ;;  %1127 = vmatprep.mubr.bf16.mxu0 %v1704_v21 }
 0x24f   : > { %v719_v1 = vmul.f32 %v1661_v51, %v1902_v44  ;;  %v658_v45 = vpop.xlane.xlu0 %657 }
 0x250   : > { %v686_v35 = vmul.f32 6.0, %v658_v45 }
 0x251   : > { %v732_v46 = vpack.c.bf16 %v719_v1, %v718_v55  ;;  %v661_v48 = vpop.xlane.xlu1 %660 }
 0x252   : > { %1666 = vrcp.f32 %v686_v35  ;;  %v687_v49 = vmul.f32 6.0, %v661_v48  ;;  %v1997_v54 = vld [vmem:[#allocation2 + $0x18] sm:$0xff] }
 0x253   : > { %741 = vst.msk [vmem:[#allocation2 + $0x20] sm:$0xff] %vm511_vm3, %v732_v46 }
 0x254   : > { %v1663_v52 = vpop.eup %1662  ;;  %1668 = vrcp.f32 %v687_v49 }
 0x255   : > { %1474 = vmatmul.mubr.msk.bf16.gmra.mrb[12].mxu1 %vm511_vm3, %v1997_v54  ;;  %1492 = vmatmul.mubr.msk.bf16.gmra.mrb[48].mxu0 %vm511_vm3, %v1997_v54  ;;  %v720_v44 = vmul.f32 %v1663_v52, %v1915_v8 }
 0x256   : > { %v1665_v63 = vpop.eup %1664  ;;  %891 = vmatprep.mubr.bf16.mxu1 %v1704_v21  ;;  %1137 = vmatprep.mubr.bf16.mxu0 %v1704_v21 }
 0x257   : > { %v721_v38 = vmul.f32 %v1665_v63, %v1922_v13  ;;  %v664_v57 = vpop.xlane.xlu0 %663 }
 0x258   : > { %v688_v58 = vmul.f32 6.0, %v664_v57 }
 0x259   : > { %v733_v41 = vpack.c.bf16 %v721_v38, %v720_v44  ;;  %v667_v60 = vpop.xlane.xlu1 %666 }
 0x25a   : > { %1670 = vrcp.f32 %v688_v58  ;;  %v689_v61 = vmul.f32 6.0, %v667_v60  ;;  %v750_v2 = vld [vmem:[#allocation2 + $0x20] sm:$0xff] }
 0x25b   : > { %742 = vst.msk [vmem:[#allocation2 + $0x28] sm:$0xff] %vm511_vm3, %v733_v41 }
 0x25c   : > { %v1667_v0 = vpop.eup %1666  ;;  %1672 = vrcp.f32 %v689_v61 }
 0x25d   : > { %1475 = vmatmul.mubr.msk.bf16.gmra.mrb[16].mxu1 %vm511_vm3, %v750_v2  ;;  %1493 = vmatmul.mubr.msk.bf16.gmra.mrb[52].mxu0 %vm511_vm3, %v750_v2  ;;  %v722_v8 = vmul.f32 %v1667_v0, %v1930_v56 }
 0x25e   : > { %v1669_v3 = vpop.eup %1668  ;;  %901 = vmatprep.mubr.bf16.mxu1 %v1704_v21  ;;  %1147 = vmatprep.mubr.bf16.mxu0 %v1704_v21 }
 0x25f   : > { %v723_v13 = vmul.f32 %v1669_v3, %v1934_v25  ;;  %v670_v4 = vpop.xlane.xlu0 %669 }
 0x260   : > { %v690_v47 = vmul.f32 6.0, %v670_v4 }
 0x261   : > { %v734_v5 = vpack.c.bf16 %v723_v13, %v722_v8  ;;  %v673_v6 = vpop.xlane.xlu1 %672 }
 0x262   : > { %1674 = vrcp.f32 %v690_v47  ;;  %v691_v7 = vmul.f32 6.0, %v673_v6  ;;  %v751_v9 = vld [vmem:[#allocation2 + $0x28] sm:$0xff] }
 0x263   : > { %743 = vst.msk [vmem:[#allocation2 + $0x30] sm:$0xff] %vm511_vm3, %v734_v5 }
 0x264   : > { %v1671_v50 = vpop.eup %1670  ;;  %1676 = vrcp.f32 %v691_v7 }
 0x265   : > { %1476 = vmatmul.mubr.msk.bf16.gmra.mrb[20].mxu1 %vm511_vm3, %v751_v9  ;;  %1494 = vmatmul.mubr.msk.bf16.gmra.mrb[56].mxu0 %vm511_vm3, %v751_v9  ;;  %v724_v56 = vmul.f32 %v1671_v50, %v1940_v34 }
 0x266   : > { %v1673_v10 = vpop.eup %1672  ;;  %911 = vmatprep.mubr.bf16.mxu1 %v1704_v21  ;;  %1157 = vmatprep.mubr.bf16.mxu0 %v1704_v21 }
 0x267   : > { %v725_v25 = vmul.f32 %v1673_v10, %v1944_v37 }
 0x269   : > { %v735_v53 = vpack.c.bf16 %v725_v25, %v724_v56 }
 0x26a   : > { %v752_v22 = vld [vmem:[#allocation2 + $0x30] sm:$0xff] }
 0x26b   : > { %744 = vst.msk [vmem:[#allocation2 + $0x38] sm:$0xff] %vm511_vm3, %v735_v53 }
 0x26c   : > { %v1675_v16 = vpop.eup %1674 }
 0x26d   : > { %1477 = vmatmul.mubr.msk.bf16.gmra.mrb[24].mxu1 %vm511_vm3, %v752_v22  ;;  %1495 = vmatmul.mubr.msk.bf16.gmra.mrb[60].mxu0 %vm511_vm3, %v752_v22  ;;  %v726_v12 = vmul.f32 %v1675_v16, %v1949_v32 }
 0x26e   : > { %v1677_v11 = vpop.eup %1676  ;;  %921 = vmatprep.mubr.bf16.mxu1 %v1704_v21  ;;  %1167 = vmatprep.mubr.bf16.mxu0 %v1704_v21 }
 0x26f   : > { %v727_v34 = vmul.f32 %v1677_v11, %v1953_v43 }
 0x271   : > { %v736_v27 = vpack.c.bf16 %v727_v34, %v726_v12 }
 0x272   : > { %v753_v37 = vld [vmem:[#allocation2 + $0x38] sm:$0xff] }
 0x273   : > { %745 = vst.msk [vmem:[#allocation2 + $0x40] sm:$0xff] %vm511_vm3, %v736_v27 }
 0x275   : > { %1478 = vmatmul.mubr.msk.bf16.gmra.mrb[28].mxu1 %vm511_vm3, %v753_v37  ;;  %1496 = vmatmul.mubr.msk.bf16.gmra.mrb[64].mxu0 %vm511_vm3, %v753_v37 }
 0x276   : > { %931 = vmatprep.mubr.bf16.mxu1 %v1704_v21  ;;  %1177 = vmatprep.mubr.bf16.mxu0 %v1704_v21 }
 0x27a   : > { %v754_v33 = vld [vmem:[#allocation2 + $0x40] sm:$0xff] }
 0x27d   : > { %1479 = vmatmul.mubr.msk.bf16.gmra.mrb[32].mxu1 %vm511_vm3, %v754_v33  ;;  %1497 = vmatmul.mubr.msk.bf16.gmra.mrb[68].mxu0 %vm511_vm3, %v754_v33 }
 0x27e   : > { %974 = vmatprep.mubr.bf16.mxu1 %v1704_v21 }
 0x285   : > { %1480 = vmatmul.mubr.msk.bf16.vlgmr.msra.gmra.mrb[36].mxu1 %vm511_vm3, %v1963_v15 }
 0x286   : > { %984 = vmatprep.mubr.bf16.mxu1 %v1704_v21 }
 0x28d   : > { %1481 = vmatmul.mubr.msk.bf16.gmra.mrb[40].mxu1 %vm511_vm3, %v1975_v59 }
 0x28e   : > { %994 = vmatprep.mubr.bf16.mxu1 %v1704_v21 }
 0x295   : > { %1482 = vmatmul.mubr.msk.bf16.gmra.mrb[44].mxu1 %vm511_vm3, %v1986_v40 }
 0x296   : > { %1004 = vmatprep.mubr.bf16.mxu1 %v1704_v21 }
 0x29d   : > { %1483 = vmatmul.mubr.msk.bf16.gmra.mrb[48].mxu1 %vm511_vm3, %v1997_v54 }
 0x29e   : > { %1014 = vmatprep.mubr.bf16.mxu1 %v1704_v21 }
 0x2a5   : > { %1484 = vmatmul.mubr.msk.bf16.gmra.mrb[52].mxu1 %vm511_vm3, %v750_v2 }
 0x2a6   : > { %1024 = vmatprep.mubr.bf16.mxu1 %v1704_v21 }
 0x2ad   : > { %1485 = vmatmul.mubr.msk.bf16.gmra.mrb[56].mxu1 %vm511_vm3, %v751_v9 }
 0x2ae   : > { %1034 = vmatprep.mubr.bf16.mxu1 %v1704_v21 }
 0x2b5   : > { %1486 = vmatmul.mubr.msk.bf16.gmra.mrb[60].mxu1 %vm511_vm3, %v752_v22 }
 0x2b6   : > { %1044 = vmatprep.mubr.bf16.mxu1 %v1704_v21 }
 0x2bd   : > { %1487 = vmatmul.mubr.msk.bf16.gmra.mrb[64].mxu1 %vm511_vm3, %v753_v37 }
 0x2be   : > { %1054 = vmatprep.mubr.bf16.mxu1 %v1704_v21 }
 0x2c5   : > { %1488 = vmatmul.mubr.msk.bf16.gmra.mrb[68].mxu1 %vm511_vm3, %v754_v33 }
 0x310   : > { %v853_v32 = vpop.f32.mrb[0].mxu1  ;;  %v1099_v43 = vpop.f32.mrb[36].mxu0 }
 0x311   : > { %1188 = vst [vmem:[%s2061_s4] sm:$0xff] %v853_v32  ;;  %1192 = vst [vmem:[%s2061_s4 + $0x20] sm:$0xff] %v1099_v43  ;;  %v855_v21 = vpop.f32.mrb[1].mxu1  ;;  %v1101_v15 = vpop.f32.mrb[37].mxu0 }
 0x312   : > { %1189 = vst [vmem:[%s2061_s4 + $0x8] sm:$0xff] %v855_v21  ;;  %1193 = vst [vmem:[%s2061_s4 + $0x28] sm:$0xff] %v1101_v15  ;;  %v857_v18 = vpop.f32.mrb[2].mxu1  ;;  %v1103_v19 = vpop.f32.mrb[38].mxu0 }
 0x313   : > { %1194 = vst [vmem:[%s2061_s4 + $0x30] sm:$0xff] %v857_v18  ;;  %1198 = vst [vmem:[%s2061_s4 + $0x50] sm:$0xff] %v1103_v19  ;;  %v859_v14 = vpop.f32.mrb[3].mxu1  ;;  %v1105_v17 = vpop.f32.mrb[39].mxu0 }
 0x314   : > { %1195 = vst [vmem:[%s2061_s4 + $0x38] sm:$0xff] %v859_v14  ;;  %1199 = vst [vmem:[%s2061_s4 + $0x58] sm:$0xff] %v1105_v17 }
 0x318   : > { %v863_v20 = vpop.f32.mrb[4].mxu1  ;;  %v1109_v24 = vpop.f32.mrb[40].mxu0 }
 0x319   : > { %1200 = vst [vmem:[%s2061_s4 + $0x60] sm:$0xff] %v863_v20  ;;  %1204 = vst [vmem:[%s2061_s4 + $0x80] sm:$0xff] %v1109_v24  ;;  %v865_v23 = vpop.f32.mrb[5].mxu1  ;;  %v1111_v59 = vpop.f32.mrb[41].mxu0 }
 0x31a   : > { %1201 = vst [vmem:[%s2061_s4 + $0x68] sm:$0xff] %v865_v23  ;;  %1205 = vst [vmem:[%s2061_s4 + $0x88] sm:$0xff] %v1111_v59  ;;  %v867_v39 = vpop.f32.mrb[6].mxu1  ;;  %v1113_v42 = vpop.f32.mrb[42].mxu0 }
 0x31b   : > { %1206 = vst [vmem:[%s2061_s4 + $0x90] sm:$0xff] %v867_v39  ;;  %1210 = vst [vmem:[%s2061_s4 + $0xb0] sm:$0xff] %v1113_v42  ;;  %v869_v28 = vpop.f32.mrb[7].mxu1  ;;  %v1115_v26 = vpop.f32.mrb[43].mxu0 }
 0x31c   : > { %1207 = vst [vmem:[%s2061_s4 + $0x98] sm:$0xff] %v869_v28  ;;  %1211 = vst [vmem:[%s2061_s4 + $0xb8] sm:$0xff] %v1115_v26 }
 0x320   : > { %v873_v30 = vpop.f32.mrb[8].mxu1  ;;  %v1119_v31 = vpop.f32.mrb[44].mxu0 }
 0x321   : > { %1212 = vst [vmem:[%s2061_s4 + $0xc0] sm:$0xff] %v873_v30  ;;  %1216 = vst [vmem:[%s2061_s4 + $0xe0] sm:$0xff] %v1119_v31  ;;  %v875_v29 = vpop.f32.mrb[9].mxu1  ;;  %v1121_v36 = vpop.f32.mrb[45].mxu0 }
 0x322   : > { %1213 = vst [vmem:[%s2061_s4 + $0xc8] sm:$0xff] %v875_v29  ;;  %1217 = vst [vmem:[%s2061_s4 + $0xe8] sm:$0xff] %v1121_v36  ;;  %v877_v62 = vpop.f32.mrb[10].mxu1  ;;  %v1123_v40 = vpop.f32.mrb[46].mxu0 }
 0x323   : > { %1218 = vst [vmem:[%s2061_s4 + $0xf0] sm:$0xff] %v877_v62  ;;  %1222 = vst [vmem:[%s2061_s4 + $0x110] sm:$0xff] %v1123_v40  ;;  %v879_v51 = vpop.f32.mrb[11].mxu1  ;;  %v1125_v55 = vpop.f32.mrb[47].mxu0 }
 0x324   : > { %1219 = vst [vmem:[%s2061_s4 + $0xf8] sm:$0xff] %v879_v51  ;;  %1223 = vst [vmem:[%s2061_s4 + $0x118] sm:$0xff] %v1125_v55 }
 0x328   : > { %v883_v1 = vpop.f32.mrb[12].mxu1  ;;  %v1129_v45 = vpop.f32.mrb[48].mxu0 }
 0x329   : > { %1224 = vst [vmem:[%s2061_s4 + $0x120] sm:$0xff] %v883_v1  ;;  %1228 = vst [vmem:[%s2061_s4 + $0x140] sm:$0xff] %v1129_v45  ;;  %v885_v35 = vpop.f32.mrb[13].mxu1  ;;  %v1131_v46 = vpop.f32.mrb[49].mxu0 }
 0x32a   : > { %1225 = vst [vmem:[%s2061_s4 + $0x128] sm:$0xff] %v885_v35  ;;  %1229 = vst [vmem:[%s2061_s4 + $0x148] sm:$0xff] %v1131_v46  ;;  %v887_v48 = vpop.f32.mrb[14].mxu1  ;;  %v1133_v49 = vpop.f32.mrb[50].mxu0 }
 0x32b   : > { %1230 = vst [vmem:[%s2061_s4 + $0x150] sm:$0xff] %v887_v48  ;;  %1234 = vst [vmem:[%s2061_s4 + $0x170] sm:$0xff] %v1133_v49  ;;  %v889_v52 = vpop.f32.mrb[15].mxu1  ;;  %v1135_v54 = vpop.f32.mrb[51].mxu0 }
 0x32c   : > { %1231 = vst [vmem:[%s2061_s4 + $0x158] sm:$0xff] %v889_v52  ;;  %1235 = vst [vmem:[%s2061_s4 + $0x178] sm:$0xff] %v1135_v54 }
 0x330   : > { %v893_v63 = vpop.f32.mrb[16].mxu1  ;;  %v1139_v44 = vpop.f32.mrb[52].mxu0 }
 0x331   : > { %1236 = vst [vmem:[%s2061_s4 + $0x180] sm:$0xff] %v893_v63  ;;  %1240 = vst [vmem:[%s2061_s4 + $0x1a0] sm:$0xff] %v1139_v44  ;;  %v895_v38 = vpop.f32.mrb[17].mxu1  ;;  %v1141_v57 = vpop.f32.mrb[53].mxu0 }
 0x332   : > { %1237 = vst [vmem:[%s2061_s4 + $0x188] sm:$0xff] %v895_v38  ;;  %1241 = vst [vmem:[%s2061_s4 + $0x1a8] sm:$0xff] %v1141_v57  ;;  %v897_v58 = vpop.f32.mrb[18].mxu1  ;;  %v1143_v41 = vpop.f32.mrb[54].mxu0 }
 0x333   : > { %1242 = vst [vmem:[%s2061_s4 + $0x1b0] sm:$0xff] %v897_v58  ;;  %1246 = vst [vmem:[%s2061_s4 + $0x1d0] sm:$0xff] %v1143_v41  ;;  %v899_v60 = vpop.f32.mrb[19].mxu1  ;;  %v1145_v61 = vpop.f32.mrb[55].mxu0 }
 0x334   : > { %1243 = vst [vmem:[%s2061_s4 + $0x1b8] sm:$0xff] %v899_v60  ;;  %1247 = vst [vmem:[%s2061_s4 + $0x1d8] sm:$0xff] %v1145_v61 }
 0x338   : > { %v903_v0 = vpop.f32.mrb[20].mxu1  ;;  %v1149_v2 = vpop.f32.mrb[56].mxu0 }
 0x339   : > { %1248 = vst [vmem:[%s2061_s4 + $0x1e0] sm:$0xff] %v903_v0  ;;  %1252 = vst [vmem:[%s2061_s4 + $0x200] sm:$0xff] %v1149_v2  ;;  %v905_v3 = vpop.f32.mrb[21].mxu1  ;;  %v1151_v8 = vpop.f32.mrb[57].mxu0 }
 0x33a   : > { %1249 = vst [vmem:[%s2061_s4 + $0x1e8] sm:$0xff] %v905_v3  ;;  %1253 = vst [vmem:[%s2061_s4 + $0x208] sm:$0xff] %v1151_v8  ;;  %v907_v13 = vpop.f32.mrb[22].mxu1  ;;  %v1153_v4 = vpop.f32.mrb[58].mxu0 }
 0x33b   : > { %1254 = vst [vmem:[%s2061_s4 + $0x210] sm:$0xff] %v907_v13  ;;  %1258 = vst [vmem:[%s2061_s4 + $0x230] sm:$0xff] %v1153_v4  ;;  %v909_v47 = vpop.f32.mrb[23].mxu1  ;;  %v1155_v5 = vpop.f32.mrb[59].mxu0 }
 0x33c   : > { %1255 = vst [vmem:[%s2061_s4 + $0x218] sm:$0xff] %v909_v47  ;;  %1259 = vst [vmem:[%s2061_s4 + $0x238] sm:$0xff] %v1155_v5 }
 0x340   : > { %v913_v6 = vpop.f32.mrb[24].mxu1  ;;  %v1159_v7 = vpop.f32.mrb[60].mxu0 }
 0x341   : > { %1260 = vst [vmem:[%s2061_s4 + $0x240] sm:$0xff] %v913_v6  ;;  %1264 = vst [vmem:[%s2061_s4 + $0x260] sm:$0xff] %v1159_v7  ;;  %v915_v50 = vpop.f32.mrb[25].mxu1  ;;  %v1161_v9 = vpop.f32.mrb[61].mxu0 }
 0x342   : > { %1261 = vst [vmem:[%s2061_s4 + $0x248] sm:$0xff] %v915_v50  ;;  %1265 = vst [vmem:[%s2061_s4 + $0x268] sm:$0xff] %v1161_v9  ;;  %v917_v10 = vpop.f32.mrb[26].mxu1  ;;  %v1163_v56 = vpop.f32.mrb[62].mxu0 }
 0x343   : > { %1266 = vst [vmem:[%s2061_s4 + $0x270] sm:$0xff] %v917_v10  ;;  %1270 = vst [vmem:[%s2061_s4 + $0x290] sm:$0xff] %v1163_v56  ;;  %v919_v25 = vpop.f32.mrb[27].mxu1  ;;  %v1165_v53 = vpop.f32.mrb[63].mxu0 }
 0x344   : > { %1267 = vst [vmem:[%s2061_s4 + $0x278] sm:$0xff] %v919_v25  ;;  %1271 = vst [vmem:[%s2061_s4 + $0x298] sm:$0xff] %v1165_v53 }
 0x348   : > { %v923_v16 = vpop.f32.mrb[28].mxu1  ;;  %v1169_v22 = vpop.f32.mrb[64].mxu0 }
 0x349   : > { %1272 = vst [vmem:[%s2061_s4 + $0x2a0] sm:$0xff] %v923_v16  ;;  %1276 = vst [vmem:[%s2061_s4 + $0x2c0] sm:$0xff] %v1169_v22  ;;  %v925_v11 = vpop.f32.mrb[29].mxu1  ;;  %v1171_v12 = vpop.f32.mrb[65].mxu0 }
 0x34a   : > { %1273 = vst [vmem:[%s2061_s4 + $0x2a8] sm:$0xff] %v925_v11  ;;  %1277 = vst [vmem:[%s2061_s4 + $0x2c8] sm:$0xff] %v1171_v12  ;;  %v927_v34 = vpop.f32.mrb[30].mxu1  ;;  %v1173_v27 = vpop.f32.mrb[66].mxu0 }
 0x34b   : > { %1278 = vst [vmem:[%s2061_s4 + $0x2d0] sm:$0xff] %v927_v34  ;;  %1282 = vst [vmem:[%s2061_s4 + $0x2f0] sm:$0xff] %v1173_v27  ;;  %v929_v37 = vpop.f32.mrb[31].mxu1  ;;  %v1175_v33 = vpop.f32.mrb[67].mxu0 }
 0x34c   : > { %1279 = vst [vmem:[%s2061_s4 + $0x2d8] sm:$0xff] %v929_v37  ;;  %1283 = vst [vmem:[%s2061_s4 + $0x2f8] sm:$0xff] %v1175_v33 }
 0x350   : > { %v933_v32 = vpop.f32.mrb[32].mxu1  ;;  %v1179_v43 = vpop.f32.mrb[68].mxu0 }
 0x351   : > { %1284 = vst [vmem:[%s2061_s4 + $0x300] sm:$0xff] %v933_v32  ;;  %1288 = vst [vmem:[%s2061_s4 + $0x320] sm:$0xff] %v1179_v43  ;;  %v935_v21 = vpop.f32.mrb[33].mxu1  ;;  %v1181_v15 = vpop.f32.mrb[69].mxu0 }
 0x352   : > { %1285 = vst [vmem:[%s2061_s4 + $0x308] sm:$0xff] %v935_v21  ;;  %1289 = vst [vmem:[%s2061_s4 + $0x328] sm:$0xff] %v1181_v15  ;;  %v937_v18 = vpop.f32.mrb[34].mxu1  ;;  %v1183_v19 = vpop.f32.mrb[70].mxu0 }
 0x353   : > { %1290 = vst [vmem:[%s2061_s4 + $0x330] sm:$0xff] %v937_v18  ;;  %1294 = vst [vmem:[%s2061_s4 + $0x350] sm:$0xff] %v1183_v19  ;;  %v939_v14 = vpop.f32.mrb[35].mxu1  ;;  %v1185_v17 = vpop.f32.mrb[71].mxu0 }
 0x354   : > { %1291 = vst [vmem:[%s2061_s4 + $0x338] sm:$0xff] %v939_v14  ;;  %1295 = vst [vmem:[%s2061_s4 + $0x358] sm:$0xff] %v1185_v17 }
 0x358   : > { %v976_v20 = vpop.f32.mrb[36].mxu1 }
 0x359   : > { %1190 = vst [vmem:[%s2061_s4 + $0x10] sm:$0xff] %v976_v20  ;;  %v978_v24 = vpop.f32.mrb[37].mxu1 }
 0x35a   : > { %1191 = vst [vmem:[%s2061_s4 + $0x18] sm:$0xff] %v978_v24  ;;  %v980_v23 = vpop.f32.mrb[38].mxu1 }
 0x35b   : > { %1196 = vst [vmem:[%s2061_s4 + $0x40] sm:$0xff] %v980_v23  ;;  %v982_v59 = vpop.f32.mrb[39].mxu1 }
 0x35c   : > { %1197 = vst [vmem:[%s2061_s4 + $0x48] sm:$0xff] %v982_v59 }
 0x360   : > { %v986_v39 = vpop.f32.mrb[40].mxu1 }
 0x361   : > { %1202 = vst [vmem:[%s2061_s4 + $0x70] sm:$0xff] %v986_v39  ;;  %v988_v42 = vpop.f32.mrb[41].mxu1 }
 0x362   : > { %1203 = vst [vmem:[%s2061_s4 + $0x78] sm:$0xff] %v988_v42  ;;  %v990_v28 = vpop.f32.mrb[42].mxu1 }
 0x363   : > { %1208 = vst [vmem:[%s2061_s4 + $0xa0] sm:$0xff] %v990_v28  ;;  %v992_v26 = vpop.f32.mrb[43].mxu1 }
 0x364   : > { %1209 = vst [vmem:[%s2061_s4 + $0xa8] sm:$0xff] %v992_v26 }
 0x368   : > { %v996_v30 = vpop.f32.mrb[44].mxu1 }
 0x369   : > { %1214 = vst [vmem:[%s2061_s4 + $0xd0] sm:$0xff] %v996_v30  ;;  %v998_v31 = vpop.f32.mrb[45].mxu1 }
 0x36a   : > { %1215 = vst [vmem:[%s2061_s4 + $0xd8] sm:$0xff] %v998_v31  ;;  %v1000_v29 = vpop.f32.mrb[46].mxu1 }
 0x36b   : > { %1220 = vst [vmem:[%s2061_s4 + $0x100] sm:$0xff] %v1000_v29  ;;  %v1002_v36 = vpop.f32.mrb[47].mxu1 }
 0x36c   : > { %1221 = vst [vmem:[%s2061_s4 + $0x108] sm:$0xff] %v1002_v36 }
 0x370   : > { %v1006_v62 = vpop.f32.mrb[48].mxu1 }
 0x371   : > { %1226 = vst [vmem:[%s2061_s4 + $0x130] sm:$0xff] %v1006_v62  ;;  %v1008_v40 = vpop.f32.mrb[49].mxu1 }
 0x372   : > { %1227 = vst [vmem:[%s2061_s4 + $0x138] sm:$0xff] %v1008_v40  ;;  %v1010_v51 = vpop.f32.mrb[50].mxu1 }
 0x373   : > { %1232 = vst [vmem:[%s2061_s4 + $0x160] sm:$0xff] %v1010_v51  ;;  %v1012_v55 = vpop.f32.mrb[51].mxu1 }
 0x374   : > { %1233 = vst [vmem:[%s2061_s4 + $0x168] sm:$0xff] %v1012_v55 }
 0x378   : > { %v1016_v1 = vpop.f32.mrb[52].mxu1 }
 0x379   : > { %1238 = vst [vmem:[%s2061_s4 + $0x190] sm:$0xff] %v1016_v1  ;;  %v1018_v45 = vpop.f32.mrb[53].mxu1 }
 0x37a   : > { %1239 = vst [vmem:[%s2061_s4 + $0x198] sm:$0xff] %v1018_v45  ;;  %v1020_v35 = vpop.f32.mrb[54].mxu1 }
 0x37b   : > { %1244 = vst [vmem:[%s2061_s4 + $0x1c0] sm:$0xff] %v1020_v35  ;;  %v1022_v46 = vpop.f32.mrb[55].mxu1 }
 0x37c   : > { %1245 = vst [vmem:[%s2061_s4 + $0x1c8] sm:$0xff] %v1022_v46 }
 0x380   : > { %v1026_v48 = vpop.f32.mrb[56].mxu1 }
 0x381   : > { %1250 = vst [vmem:[%s2061_s4 + $0x1f0] sm:$0xff] %v1026_v48  ;;  %v1028_v49 = vpop.f32.mrb[57].mxu1 }
 0x382   : > { %1251 = vst [vmem:[%s2061_s4 + $0x1f8] sm:$0xff] %v1028_v49  ;;  %v1030_v52 = vpop.f32.mrb[58].mxu1 }
 0x383   : > { %1256 = vst [vmem:[%s2061_s4 + $0x220] sm:$0xff] %v1030_v52  ;;  %v1032_v54 = vpop.f32.mrb[59].mxu1 }
 0x384   : > { %1257 = vst [vmem:[%s2061_s4 + $0x228] sm:$0xff] %v1032_v54 }
 0x388   : > { %v1036_v63 = vpop.f32.mrb[60].mxu1 }
 0x389   : > { %1262 = vst [vmem:[%s2061_s4 + $0x250] sm:$0xff] %v1036_v63  ;;  %v1038_v44 = vpop.f32.mrb[61].mxu1 }
 0x38a   : > { %1263 = vst [vmem:[%s2061_s4 + $0x258] sm:$0xff] %v1038_v44  ;;  %v1040_v38 = vpop.f32.mrb[62].mxu1 }
 0x38b   : > { %1268 = vst [vmem:[%s2061_s4 + $0x280] sm:$0xff] %v1040_v38  ;;  %v1042_v57 = vpop.f32.mrb[63].mxu1 }
 0x38c   : > { %1269 = vst [vmem:[%s2061_s4 + $0x288] sm:$0xff] %v1042_v57 }
 0x390   : > { %v1046_v58 = vpop.f32.mrb[64].mxu1 }
 0x391   : > { %1274 = vst [vmem:[%s2061_s4 + $0x2b0] sm:$0xff] %v1046_v58  ;;  %v1048_v41 = vpop.f32.mrb[65].mxu1 }
 0x392   : > { %1275 = vst [vmem:[%s2061_s4 + $0x2b8] sm:$0xff] %v1048_v41  ;;  %v1050_v60 = vpop.f32.mrb[66].mxu1 }
 0x393   : > { %1280 = vst [vmem:[%s2061_s4 + $0x2e0] sm:$0xff] %v1050_v60  ;;  %v1052_v61 = vpop.f32.mrb[67].mxu1 }
 0x394   : > { %1281 = vst [vmem:[%s2061_s4 + $0x2e8] sm:$0xff] %v1052_v61 }
 0x398   : > { %v1056_v0 = vpop.f32.mrb[68].mxu1 }
 0x399   : > { %1286 = vst [vmem:[%s2061_s4 + $0x310] sm:$0xff] %v1056_v0  ;;  %v1058_v2 = vpop.f32.mrb[69].mxu1 }
 0x39a   : > { %1287 = vst [vmem:[%s2061_s4 + $0x318] sm:$0xff] %v1058_v2  ;;  %v1060_v3 = vpop.f32.mrb[70].mxu1 }
 0x39b   : > { %1292 = vst [vmem:[%s2061_s4 + $0x340] sm:$0xff] %v1060_v3  ;;  %v1062_v8 = vpop.f32.mrb[71].mxu1 }
 0x39c   : > { %1293 = vst [vmem:[%s2061_s4 + $0x348] sm:$0xff] %v1062_v8 }
 0x39d PF: > { %s13_s14 = sadd.s32 1, %s1700_s14   ;;  %s2184_s12 = smov %s1696_s13 }
 0x39e   : > { %p10_p5 = scmp.ge.s32.totalorder %s13_s14, 4   ;;  %s2185_s13 = smov %s2187_s15 }
 0x3a0   :  { %12 = sbr.rel (!%p10_p5) target bundleno = 2 (0x2), region = 72 }

</bundles_post_ra>
